<compile_context>
chip_gen: v7x
topology: tpu7x:2x2x1
jax: 0.10.0
libtpu: 0.0.40
codegen_flags: <defaults>
</compile_context>

<pallas_src>
import functools

import jax
import jax.numpy as jnp
from jax.experimental import pallas as pl
from jax.experimental.pallas import tpu as pltpu

INPUT = 24
HIDDEN = 64
OUT = 24


def _lstm_kernel(x_ref,      # ((T+1)*Bp, INPUT)  time-major, batch padded to Bp, last step zeros
                 wx_ref,     # (32, 8H)  rows 0:24 = Wih0 (layer-0 slots), row 24 = fused bias row
                 wh_ref,     # (2H, 8H)  fused recurrent weight [[Whh0, Wih1], [0, Whh1]]
                 wo_ref,     # (136, OUT) rows 64:128 = Wlin, row 128 = blin, rest zero
                 out_ref,    # (B, OUT)
                 xadd_ref,   # VMEM scratch ((T+1)*Bp, 8H)
                 *, seq_len, batch, batch_pad):
    T, B, BP = seq_len, batch, batch_pad
    H = HIDDEN
    H2 = 2 * H            # fused (layer0 | layer1) width = 128 lanes
    # fused gate width = 4 * H2 = 512 lanes

    # Hoisted: per-timestep additive gate terms for BOTH layers in the interleaved layout
    # [i0 i1 | f0 f1 | o0 o1 | g0 g1]. Layer-0 slots get x(t)@Wih0 + (b_ih0 + b_hh0); layer-1
    # slots get just (b_ih1 + b_hh1) (their h terms come from the per-step fused matmul).
    xadd_ref[...] = (
        jnp.dot(x_ref[...], wx_ref[0:INPUT, :], preferred_element_type=jnp.float32)
        + wx_ref[INPUT:INPUT + 1, :])

    def sigmoid1(x):
        # Single native EUP tanh push; jax.nn.sigmoid may lower to exp + reciprocal (2 pushes).
        return 0.5 * jnp.tanh(0.5 * x) + 0.5

    def apply_gates(g, c):
        # Every slice is a whole, lane-aligned 128-lane block: no cross-lane shuffles.
        sig = sigmoid1(g[:, :3 * H2])
        i_g = sig[:, 0 * H2:1 * H2]
        f_g = sig[:, 1 * H2:2 * H2]
        o_g = sig[:, 2 * H2:3 * H2]
        g_g = jnp.tanh(g[:, 3 * H2:])
        c_new = f_g * c + i_g * g_g
        h_new = o_g * jnp.tanh(c_new)
        return h_new, c_new

    # Skewed recurrence. Fused state h01 = [h0 | h1], c01 = [c0 | c1] is (BP, 128), carried in
    # vregs. Iteration 0 needs no matmul (all-zero initial state); iterations 1..T each do one
    # fused MXU pass.
    c01 = jnp.zeros((BP, H2), jnp.float32)
    h01, c01 = apply_gates(xadd_ref[0:BP, :], c01)
    # The layer-1 half just produced a fictitious "time -1" cell from the bias alone; the true
    # initial layer-1 state is zero, so mask it out (one-time cost, off the hot loop).
    keep_l0 = jax.lax.broadcasted_iota(jnp.int32, (BP, H2), 1) < H
    h01 = jnp.where(keep_l0, h01, 0.0)
    c01 = jnp.where(keep_l0, c01, 0.0)

    # TODO(synk): nn.LSTM dropout (p=0.2) between layers is training-only; eval forward is identity.
    for s in range(1, T + 1):
        # [h0(s-1) | h1(s-2)] @ [[Whh0, Wih1], [0, Whh1]] produces layer-0's recurrent term for
        # time s and layer-1's full (pre-bias) gates for time s-1 in one MXU pass. The weight is
        # read from VMEM at the use site so the unrolled loop does not pin it in vregs.
        g = (jnp.dot(h01, wh_ref[...], preferred_element_type=jnp.float32)
             + xadd_ref[s * BP:(s + 1) * BP, :])
        h01, c01 = apply_gates(g, c01)

    # h01 = [h0(T) (dummy epilogue step, discarded) | h1(T-1)]. The output projection weight has
    # zero rows for the layer-0 half, so no 64-lane slice of h01 is needed.
    logits = (jnp.dot(h01, wo_ref[0:H2, :], preferred_element_type=jnp.float32)
              + wo_ref[H2:H2 + 1, :])                                   # (BP, OUT)
    m = jnp.max(logits, axis=-1, keepdims=True)
    z = logits - m
    lse = jnp.log(jnp.sum(jnp.exp(z), axis=-1, keepdims=True))
    out_ref[...] = (z - lse)[:B, :]


def prepare_params(params):
    """One-time (model-load) repack of the weights into the kernel's fused layout.

    Fused gate-column layout per 128-lane block: [i0 i1 | f0 f1 | o0 o1 | g0 g1], where 0/1 are
    the two LSTM layers and the source gate order is PyTorch's (i, f, g, o).
    """
    (wih0, whh0, b0, wih1, whh1, b1, wlin, blin) = params
    H = HIDDEN
    src = (0, 1, 3, 2)                      # desired (i, f, o, g) <- source (i, f, g, o)

    def gate(w, k):
        s = src[k]
        return w[:, s * H:(s + 1) * H]

    wx = jnp.zeros((32, 8 * H), jnp.float32)          # rows 0:24 Wih0 (layer-0 slots), row 24 bias
    wh = jnp.zeros((2 * H, 8 * H), jnp.float32)       # [[Whh0, Wih1], [0, Whh1]]
    for k in range(4):
        l0 = slice(2 * k * H, (2 * k + 1) * H)        # layer-0 slot of gate k
        l1 = slice((2 * k + 1) * H, (2 * k + 2) * H)  # layer-1 slot of gate k
        wx = wx.at[0:INPUT, l0].set(gate(wih0, k))
        wx = wx.at[INPUT, l0].set(gate(b0, k)[0])
        wx = wx.at[INPUT, l1].set(gate(b1, k)[0])
        wh = wh.at[0:H, l0].set(gate(whh0, k))
        wh = wh.at[0:H, l1].set(gate(wih1, k))
        wh = wh.at[H:2 * H, l1].set(gate(whh1, k))

    wo = jnp.zeros((136, OUT), jnp.float32)           # 8-row-padded stack of [0; Wlin; blin]
    wo = wo.at[H:2 * H, :].set(wlin)
    wo = wo.at[2 * H, :].set(blin[0])
    return (wx, wh, wo)


@jax.jit
def lstm_forward(sequence, prepped):
    """sequence: (B, T, 24) float32 -> (B, 24) log-probabilities."""
    wx, wh, wo = prepped
    seq = jnp.asarray(sequence, jnp.float32)
    B, T, _ = seq.shape
    BP = ((B + 7) // 8) * 8                 # pad batch to a sublane tile so per-step slices of
                                            # the hoisted projection start at 8-row boundaries
    x_tm = jnp.transpose(seq, (1, 0, 2))    # time-major (T, B, I)
    # +1 zero timestep: the skewed epilogue iteration reads it; its layer-0 result is discarded.
    x_pad = jnp.pad(x_tm, ((0, 1), (0, BP - B), (0, 0)))
    x2d = x_pad.reshape((T + 1) * BP, INPUT)

    kernel = functools.partial(_lstm_kernel, seq_len=T, batch=B, batch_pad=BP)
    return pl.pallas_call(
        kernel,
        out_shape=jax.ShapeDtypeStruct((B, OUT), jnp.float32),
        in_specs=[pl.BlockSpec(memory_space=pltpu.MemorySpace.VMEM)] * 4,
        out_specs=pl.BlockSpec(memory_space=pltpu.MemorySpace.VMEM),
        scratch_shapes=[pltpu.VMEM(((T + 1) * BP, 8 * HIDDEN), jnp.float32)],
    )(x2d, wx, wh, wo)


def init_params(key):
    """Deterministic init mimicking PyTorch uniform(-1/sqrt(H), 1/sqrt(H)).

    Weights are stored pre-transposed, gate order (i, f, g, o), biases combined (b_ih + b_hh).
    """
    k = 1.0 / jnp.sqrt(jnp.float32(HIDDEN))
    keys = jax.random.split(key, 12)
    u = lambda kk, shape: jax.random.uniform(kk, shape, jnp.float32, -k, k)

    wih0 = u(keys[0], (INPUT, 4 * HIDDEN))
    whh0 = u(keys[1], (HIDDEN, 4 * HIDDEN))
    b0 = u(keys[2], (1, 4 * HIDDEN)) + u(keys[3], (1, 4 * HIDDEN))
    wih1 = u(keys[4], (HIDDEN, 4 * HIDDEN))
    whh1 = u(keys[5], (HIDDEN, 4 * HIDDEN))
    b1 = u(keys[6], (1, 4 * HIDDEN)) + u(keys[7], (1, 4 * HIDDEN))
    wlin = u(keys[8], (HIDDEN, OUT))
    blin = u(keys[9], (1, OUT))
    return (wih0, whh0, b0, wih1, whh1, b1, wlin, blin)


def reference_forward(sequence, params):
    """Pure-JAX reference (standard i,f,g,o LSTM math) for correctness checking."""
    (wih0, whh0, b0, wih1, whh1, b1, wlin, blin) = params
    x_tm = jnp.transpose(sequence, (1, 0, 2)).astype(jnp.float32)
    T, B, _ = x_tm.shape
    H = HIDDEN

    def cell(x, h, c, wih, whh, b):
        g = x @ wih + h @ whh + b
        i = jax.nn.sigmoid(g[:, 0 * H:1 * H])
        f = jax.nn.sigmoid(g[:, 1 * H:2 * H])
        gg = jnp.tanh(g[:, 2 * H:3 * H])
        o = jax.nn.sigmoid(g[:, 3 * H:4 * H])
        c = f * c + i * gg
        h = o * jnp.tanh(c)
        return h, c

    h0 = c0 = h1 = c1 = jnp.zeros((B, H), jnp.float32)
    for t in range(T):
        h0, c0 = cell(x_tm[t], h0, c0, wih0, whh0, b0)
        h1, c1 = cell(h0, h1, c1, wih1, whh1, b1)
    logits = h1 @ wlin + blin
    return jax.nn.log_softmax(logits, axis=1)


if __name__ == "__main__":
    key = jax.random.PRNGKey(0)
    pkey, xkey = jax.random.split(key)

    params = init_params(pkey)
    prepped = prepare_params(params)        # one-time weight repack, kept out of the jitted forward

    B, T = 2, 8
    sequence = jax.random.normal(xkey, (B, T, INPUT), jnp.float32)    # (batch, seq, feat)

    out = jax.block_until_ready(lstm_forward(sequence, prepped))

    ref = reference_forward(sequence, params)
    assert out.shape == (B, OUT)
    assert jnp.allclose(out, ref, atol=1e-4, rtol=1e-4), "mismatch vs. reference"

    print("KERNEL_OK")
</pallas_src>

<mosaic_0001>
module attributes {stable_mosaic.version = 11 : i64} {
  func.func @_lstm_kernel(%arg0: memref<72x24xf32, #tpu.memory_space<vmem>>, %arg1: memref<32x512xf32, #tpu.memory_space<vmem>>, %arg2: memref<128x512xf32, #tpu.memory_space<vmem>>, %arg3: memref<136x24xf32, #tpu.memory_space<vmem>>, %arg4: memref<2x24xf32, #tpu.memory_space<vmem>>, %arg5: memref<72x512xf32, #tpu.memory_space<vmem>>) attributes {dimension_semantics = [], scalar_prefetch = 0 : i64, scratch_operands = 1 : i64, tpu.core_type = #tpu.core_type<tc>} {
    %c0 = arith.constant 0 : index
    %c0_0 = arith.constant 0 : index
    %0 = vector.load %arg0[%c0, %c0_0] : memref<72x24xf32, #tpu.memory_space<vmem>>, vector<72x24xf32>
    %c0_1 = arith.constant 0 : index
    %c0_2 = arith.constant 0 : index
    %1 = vector.load %arg1[%c0_1, %c0_2] : memref<32x512xf32, #tpu.memory_space<vmem>>, vector<24x512xf32>
    %cst = arith.constant dense<0.000000e+00> : vector<72x512xf32>
    %2 = tpu.matmul %0, %1, %cst {dimension_numbers = #tpu.dot_dimension_numbers<[1], [0], [0], [1], [0, 0, 1, 1], [], []>} : vector<72x24xf32>, vector<24x512xf32>, vector<72x512xf32> -> vector<72x512xf32>
    %c24 = arith.constant 24 : index
    %c0_3 = arith.constant 0 : index
    %3 = vector.load %arg1[%c24, %c0_3] : memref<32x512xf32, #tpu.memory_space<vmem>>, vector<1x512xf32>
    %4 = vector.broadcast %3 : vector<1x512xf32> to vector<72x512xf32>
    %5 = arith.addf %2, %4 : vector<72x512xf32>
    %c0_4 = arith.constant 0 : index
    %c0_5 = arith.constant 0 : index
    %6 = vector.load %arg5[%c0_4, %c0_5] : memref<72x512xf32, #tpu.memory_space<vmem>>, vector<72x512xf32>
    tpu.vector_store %arg5[%c0_4, %c0_5], %5 {strides = array<i32>} : memref<72x512xf32, #tpu.memory_space<vmem>>, vector<72x512xf32>,
    %cst_6 = arith.constant 0.000000e+00 : f32
    %7 = vector.broadcast %cst_6 : f32 to vector<8x128xf32>
    %c0_7 = arith.constant 0 : index
    %c0_8 = arith.constant 0 : index
    %8 = vector.load %arg5[%c0_7, %c0_8] : memref<72x512xf32, #tpu.memory_space<vmem>>, vector<8x512xf32>
    %9 = vector.extract_strided_slice %8 {offsets = [0, 0], sizes = [8, 384], strides = [1, 1]} : vector<8x512xf32> to vector<8x384xf32>
    %cst_9 = arith.constant 5.000000e-01 : f32
    %10 = vector.broadcast %cst_9 : f32 to vector<8x384xf32>
    %11 = arith.mulf %10, %9 : vector<8x384xf32>
    %12 = math.tanh %11 : vector<8x384xf32>
    %cst_10 = arith.constant 5.000000e-01 : f32
    %13 = vector.broadcast %cst_10 : f32 to vector<8x384xf32>
    %14 = arith.mulf %13, %12 : vector<8x384xf32>
    %cst_11 = arith.constant 5.000000e-01 : f32
    %15 = vector.broadcast %cst_11 : f32 to vector<8x384xf32>
    %16 = arith.addf %14, %15 : vector<8x384xf32>
    %17 = vector.extract_strided_slice %16 {offsets = [0, 0], sizes = [8, 128], strides = [1, 1]} : vector<8x384xf32> to vector<8x128xf32>
    %18 = vector.extract_strided_slice %16 {offsets = [0, 128], sizes = [8, 128], strides = [1, 1]} : vector<8x384xf32> to vector<8x128xf32>
    %19 = vector.extract_strided_slice %16 {offsets = [0, 256], sizes = [8, 128], strides = [1, 1]} : vector<8x384xf32> to vector<8x128xf32>
    %20 = vector.extract_strided_slice %8 {offsets = [0, 384], sizes = [8, 128], strides = [1, 1]} : vector<8x512xf32> to vector<8x128xf32>
    %21 = math.tanh %20 : vector<8x128xf32>
    %22 = arith.mulf %18, %7 : vector<8x128xf32>
    %23 = arith.mulf %17, %21 : vector<8x128xf32>
    %24 = arith.addf %22, %23 : vector<8x128xf32>
    %25 = math.tanh %24 : vector<8x128xf32>
    %26 = arith.mulf %19, %25 : vector<8x128xf32>
    %27 = tpu.iota {dimensions = array<i32: 1>} : vector<8x128xi32>
    %c64_i32 = arith.constant 64 : i32
    %28 = vector.broadcast %c64_i32 : i32 to vector<8x128xi32>
    %29 = arith.cmpi slt, %27, %28 : vector<8x128xi32>
    %cst_12 = arith.constant 0.000000e+00 : f32
    %30 = vector.broadcast %cst_12 : f32 to vector<8x128xf32>
    %31 = arith.select %29, %26, %30 : vector<8x128xi1>, vector<8x128xf32>
    %cst_13 = arith.constant 0.000000e+00 : f32
    %32 = vector.broadcast %cst_13 : f32 to vector<8x128xf32>
    %33 = arith.select %29, %24, %32 : vector<8x128xi1>, vector<8x128xf32>
    %c0_14 = arith.constant 0 : index
    %c0_15 = arith.constant 0 : index
    %34 = vector.load %arg2[%c0_14, %c0_15] : memref<128x512xf32, #tpu.memory_space<vmem>>, vector<128x512xf32>
    %cst_16 = arith.constant dense<0.000000e+00> : vector<8x512xf32>
    %35 = tpu.matmul %31, %34, %cst_16 {dimension_numbers = #tpu.dot_dimension_numbers<[1], [0], [0], [1], [0, 0, 1, 1], [], []>} : vector<8x128xf32>, vector<128x512xf32>, vector<8x512xf32> -> vector<8x512xf32>
    %c8 = arith.constant 8 : index
    %c0_17 = arith.constant 0 : index
    %36 = vector.load %arg5[%c8, %c0_17] : memref<72x512xf32, #tpu.memory_space<vmem>>, vector<8x512xf32>
    %37 = arith.addf %35, %36 : vector<8x512xf32>
    %38 = vector.extract_strided_slice %37 {offsets = [0, 0], sizes = [8, 384], strides = [1, 1]} : vector<8x512xf32> to vector<8x384xf32>
    %cst_18 = arith.constant 5.000000e-01 : f32
    %39 = vector.broadcast %cst_18 : f32 to vector<8x384xf32>
    %40 = arith.mulf %39, %38 : vector<8x384xf32>
    %41 = math.tanh %40 : vector<8x384xf32>
    %cst_19 = arith.constant 5.000000e-01 : f32
    %42 = vector.broadcast %cst_19 : f32 to vector<8x384xf32>
    %43 = arith.mulf %42, %41 : vector<8x384xf32>
    %cst_20 = arith.constant 5.000000e-01 : f32
    %44 = vector.broadcast %cst_20 : f32 to vector<8x384xf32>
    %45 = arith.addf %43, %44 : vector<8x384xf32>
    %46 = vector.extract_strided_slice %45 {offsets = [0, 0], sizes = [8, 128], strides = [1, 1]} : vector<8x384xf32> to vector<8x128xf32>
    %47 = vector.extract_strided_slice %45 {offsets = [0, 128], sizes = [8, 128], strides = [1, 1]} : vector<8x384xf32> to vector<8x128xf32>
    %48 = vector.extract_strided_slice %45 {offsets = [0, 256], sizes = [8, 128], strides = [1, 1]} : vector<8x384xf32> to vector<8x128xf32>
    %49 = vector.extract_strided_slice %37 {offsets = [0, 384], sizes = [8, 128], strides = [1, 1]} : vector<8x512xf32> to vector<8x128xf32>
    %50 = math.tanh %49 : vector<8x128xf32>
    %51 = arith.mulf %47, %33 : vector<8x128xf32>
    %52 = arith.mulf %46, %50 : vector<8x128xf32>
    %53 = arith.addf %51, %52 : vector<8x128xf32>
    %54 = math.tanh %53 : vector<8x128xf32>
    %55 = arith.mulf %48, %54 : vector<8x128xf32>
    %c0_21 = arith.constant 0 : index
    %c0_22 = arith.constant 0 : index
    %56 = vector.load %arg2[%c0_21, %c0_22] : memref<128x512xf32, #tpu.memory_space<vmem>>, vector<128x512xf32>
    %cst_23 = arith.constant dense<0.000000e+00> : vector<8x512xf32>
    %57 = tpu.matmul %55, %56, %cst_23 {dimension_numbers = #tpu.dot_dimension_numbers<[1], [0], [0], [1], [0, 0, 1, 1], [], []>} : vector<8x128xf32>, vector<128x512xf32>, vector<8x512xf32> -> vector<8x512xf32>
    %c16 = arith.constant 16 : index
    %c0_24 = arith.constant 0 : index
    %58 = vector.load %arg5[%c16, %c0_24] : memref<72x512xf32, #tpu.memory_space<vmem>>, vector<8x512xf32>
    %59 = arith.addf %57, %58 : vector<8x512xf32>
    %60 = vector.extract_strided_slice %59 {offsets = [0, 0], sizes = [8, 384], strides = [1, 1]} : vector<8x512xf32> to vector<8x384xf32>
    %cst_25 = arith.constant 5.000000e-01 : f32
    %61 = vector.broadcast %cst_25 : f32 to vector<8x384xf32>
    %62 = arith.mulf %61, %60 : vector<8x384xf32>
    %63 = math.tanh %62 : vector<8x384xf32>
    %cst_26 = arith.constant 5.000000e-01 : f32
    %64 = vector.broadcast %cst_26 : f32 to vector<8x384xf32>
    %65 = arith.mulf %64, %63 : vector<8x384xf32>
    %cst_27 = arith.constant 5.000000e-01 : f32
    %66 = vector.broadcast %cst_27 : f32 to vector<8x384xf32>
    %67 = arith.addf %65, %66 : vector<8x384xf32>
    %68 = vector.extract_strided_slice %67 {offsets = [0, 0], sizes = [8, 128], strides = [1, 1]} : vector<8x384xf32> to vector<8x128xf32>
    %69 = vector.extract_strided_slice %67 {offsets = [0, 128], sizes = [8, 128], strides = [1, 1]} : vector<8x384xf32> to vector<8x128xf32>
    %70 = vector.extract_strided_slice %67 {offsets = [0, 256], sizes = [8, 128], strides = [1, 1]} : vector<8x384xf32> to vector<8x128xf32>
    %71 = vector.extract_strided_slice %59 {offsets = [0, 384], sizes = [8, 128], strides = [1, 1]} : vector<8x512xf32> to vector<8x128xf32>
    %72 = math.tanh %71 : vector<8x128xf32>
    %73 = arith.mulf %69, %53 : vector<8x128xf32>
    %74 = arith.mulf %68, %72 : vector<8x128xf32>
    %75 = arith.addf %73, %74 : vector<8x128xf32>
    %76 = math.tanh %75 : vector<8x128xf32>
    %77 = arith.mulf %70, %76 : vector<8x128xf32>
    %c0_28 = arith.constant 0 : index
    %c0_29 = arith.constant 0 : index
    %78 = vector.load %arg2[%c0_28, %c0_29] : memref<128x512xf32, #tpu.memory_space<vmem>>, vector<128x512xf32>
    %cst_30 = arith.constant dense<0.000000e+00> : vector<8x512xf32>
    %79 = tpu.matmul %77, %78, %cst_30 {dimension_numbers = #tpu.dot_dimension_numbers<[1], [0], [0], [1], [0, 0, 1, 1], [], []>} : vector<8x128xf32>, vector<128x512xf32>, vector<8x512xf32> -> vector<8x512xf32>
    %c24_31 = arith.constant 24 : index
    %c0_32 = arith.constant 0 : index
    %80 = vector.load %arg5[%c24_31, %c0_32] : memref<72x512xf32, #tpu.memory_space<vmem>>, vector<8x512xf32>
    %81 = arith.addf %79, %80 : vector<8x512xf32>
    %82 = vector.extract_strided_slice %81 {offsets = [0, 0], sizes = [8, 384], strides = [1, 1]} : vector<8x512xf32> to vector<8x384xf32>
    %cst_33 = arith.constant 5.000000e-01 : f32
    %83 = vector.broadcast %cst_33 : f32 to vector<8x384xf32>
    %84 = arith.mulf %83, %82 : vector<8x384xf32>
    %85 = math.tanh %84 : vector<8x384xf32>
    %cst_34 = arith.constant 5.000000e-01 : f32
    %86 = vector.broadcast %cst_34 : f32 to vector<8x384xf32>
    %87 = arith.mulf %86, %85 : vector<8x384xf32>
    %cst_35 = arith.constant 5.000000e-01 : f32
    %88 = vector.broadcast %cst_35 : f32 to vector<8x384xf32>
    %89 = arith.addf %87, %88 : vector<8x384xf32>
    %90 = vector.extract_strided_slice %89 {offsets = [0, 0], sizes = [8, 128], strides = [1, 1]} : vector<8x384xf32> to vector<8x128xf32>
    %91 = vector.extract_strided_slice %89 {offsets = [0, 128], sizes = [8, 128], strides = [1, 1]} : vector<8x384xf32> to vector<8x128xf32>
    %92 = vector.extract_strided_slice %89 {offsets = [0, 256], sizes = [8, 128], strides = [1, 1]} : vector<8x384xf32> to vector<8x128xf32>
    %93 = vector.extract_strided_slice %81 {offsets = [0, 384], sizes = [8, 128], strides = [1, 1]} : vector<8x512xf32> to vector<8x128xf32>
    %94 = math.tanh %93 : vector<8x128xf32>
    %95 = arith.mulf %91, %75 : vector<8x128xf32>
    %96 = arith.mulf %90, %94 : vector<8x128xf32>
    %97 = arith.addf %95, %96 : vector<8x128xf32>
    %98 = math.tanh %97 : vector<8x128xf32>
    %99 = arith.mulf %92, %98 : vector<8x128xf32>
    %c0_36 = arith.constant 0 : index
    %c0_37 = arith.constant 0 : index
    %100 = vector.load %arg2[%c0_36, %c0_37] : memref<128x512xf32, #tpu.memory_space<vmem>>, vector<128x512xf32>
    %cst_38 = arith.constant dense<0.000000e+00> : vector<8x512xf32>
    %101 = tpu.matmul %99, %100, %cst_38 {dimension_numbers = #tpu.dot_dimension_numbers<[1], [0], [0], [1], [0, 0, 1, 1], [], []>} : vector<8x128xf32>, vector<128x512xf32>, vector<8x512xf32> -> vector<8x512xf32>
    %c32 = arith.constant 32 : index
    %c0_39 = arith.constant 0 : index
    %102 = vector.load %arg5[%c32, %c0_39] : memref<72x512xf32, #tpu.memory_space<vmem>>, vector<8x512xf32>
    %103 = arith.addf %101, %102 : vector<8x512xf32>
    %104 = vector.extract_strided_slice %103 {offsets = [0, 0], sizes = [8, 384], strides = [1, 1]} : vector<8x512xf32> to vector<8x384xf32>
    %cst_40 = arith.constant 5.000000e-01 : f32
    %105 = vector.broadcast %cst_40 : f32 to vector<8x384xf32>
    %106 = arith.mulf %105, %104 : vector<8x384xf32>
    %107 = math.tanh %106 : vector<8x384xf32>
    %cst_41 = arith.constant 5.000000e-01 : f32
    %108 = vector.broadcast %cst_41 : f32 to vector<8x384xf32>
    %109 = arith.mulf %108, %107 : vector<8x384xf32>
    %cst_42 = arith.constant 5.000000e-01 : f32
    %110 = vector.broadcast %cst_42 : f32 to vector<8x384xf32>
    %111 = arith.addf %109, %110 : vector<8x384xf32>
    %112 = vector.extract_strided_slice %111 {offsets = [0, 0], sizes = [8, 128], strides = [1, 1]} : vector<8x384xf32> to vector<8x128xf32>
    %113 = vector.extract_strided_slice %111 {offsets = [0, 128], sizes = [8, 128], strides = [1, 1]} : vector<8x384xf32> to vector<8x128xf32>
    %114 = vector.extract_strided_slice %111 {offsets = [0, 256], sizes = [8, 128], strides = [1, 1]} : vector<8x384xf32> to vector<8x128xf32>
    %115 = vector.extract_strided_slice %103 {offsets = [0, 384], sizes = [8, 128], strides = [1, 1]} : vector<8x512xf32> to vector<8x128xf32>
    %116 = math.tanh %115 : vector<8x128xf32>
    %117 = arith.mulf %113, %97 : vector<8x128xf32>
    %118 = arith.mulf %112, %116 : vector<8x128xf32>
    %119 = arith.addf %117, %118 : vector<8x128xf32>
    %120 = math.tanh %119 : vector<8x128xf32>
    %121 = arith.mulf %114, %120 : vector<8x128xf32>
    %c0_43 = arith.constant 0 : index
    %c0_44 = arith.constant 0 : index
    %122 = vector.load %arg2[%c0_43, %c0_44] : memref<128x512xf32, #tpu.memory_space<vmem>>, vector<128x512xf32>
    %cst_45 = arith.constant dense<0.000000e+00> : vector<8x512xf32>
    %123 = tpu.matmul %121, %122, %cst_45 {dimension_numbers = #tpu.dot_dimension_numbers<[1], [0], [0], [1], [0, 0, 1, 1], [], []>} : vector<8x128xf32>, vector<128x512xf32>, vector<8x512xf32> -> vector<8x512xf32>
    %c40 = arith.constant 40 : index
    %c0_46 = arith.constant 0 : index
    %124 = vector.load %arg5[%c40, %c0_46] : memref<72x512xf32, #tpu.memory_space<vmem>>, vector<8x512xf32>
    %125 = arith.addf %123, %124 : vector<8x512xf32>
    %126 = vector.extract_strided_slice %125 {offsets = [0, 0], sizes = [8, 384], strides = [1, 1]} : vector<8x512xf32> to vector<8x384xf32>
    %cst_47 = arith.constant 5.000000e-01 : f32
    %127 = vector.broadcast %cst_47 : f32 to vector<8x384xf32>
    %128 = arith.mulf %127, %126 : vector<8x384xf32>
    %129 = math.tanh %128 : vector<8x384xf32>
    %cst_48 = arith.constant 5.000000e-01 : f32
    %130 = vector.broadcast %cst_48 : f32 to vector<8x384xf32>
    %131 = arith.mulf %130, %129 : vector<8x384xf32>
    %cst_49 = arith.constant 5.000000e-01 : f32
    %132 = vector.broadcast %cst_49 : f32 to vector<8x384xf32>
    %133 = arith.addf %131, %132 : vector<8x384xf32>
    %134 = vector.extract_strided_slice %133 {offsets = [0, 0], sizes = [8, 128], strides = [1, 1]} : vector<8x384xf32> to vector<8x128xf32>
    %135 = vector.extract_strided_slice %133 {offsets = [0, 128], sizes = [8, 128], strides = [1, 1]} : vector<8x384xf32> to vector<8x128xf32>
    %136 = vector.extract_strided_slice %133 {offsets = [0, 256], sizes = [8, 128], strides = [1, 1]} : vector<8x384xf32> to vector<8x128xf32>
    %137 = vector.extract_strided_slice %125 {offsets = [0, 384], sizes = [8, 128], strides = [1, 1]} : vector<8x512xf32> to vector<8x128xf32>
    %138 = math.tanh %137 : vector<8x128xf32>
    %139 = arith.mulf %135, %119 : vector<8x128xf32>
    %140 = arith.mulf %134, %138 : vector<8x128xf32>
    %141 = arith.addf %139, %140 : vector<8x128xf32>
    %142 = math.tanh %141 : vector<8x128xf32>
    %143 = arith.mulf %136, %142 : vector<8x128xf32>
    %c0_50 = arith.constant 0 : index
    %c0_51 = arith.constant 0 : index
    %144 = vector.load %arg2[%c0_50, %c0_51] : memref<128x512xf32, #tpu.memory_space<vmem>>, vector<128x512xf32>
    %cst_52 = arith.constant dense<0.000000e+00> : vector<8x512xf32>
    %145 = tpu.matmul %143, %144, %cst_52 {dimension_numbers = #tpu.dot_dimension_numbers<[1], [0], [0], [1], [0, 0, 1, 1], [], []>} : vector<8x128xf32>, vector<128x512xf32>, vector<8x512xf32> -> vector<8x512xf32>
    %c48 = arith.constant 48 : index
    %c0_53 = arith.constant 0 : index
    %146 = vector.load %arg5[%c48, %c0_53] : memref<72x512xf32, #tpu.memory_space<vmem>>, vector<8x512xf32>
    %147 = arith.addf %145, %146 : vector<8x512xf32>
    %148 = vector.extract_strided_slice %147 {offsets = [0, 0], sizes = [8, 384], strides = [1, 1]} : vector<8x512xf32> to vector<8x384xf32>
    %cst_54 = arith.constant 5.000000e-01 : f32
    %149 = vector.broadcast %cst_54 : f32 to vector<8x384xf32>
    %150 = arith.mulf %149, %148 : vector<8x384xf32>
    %151 = math.tanh %150 : vector<8x384xf32>
    %cst_55 = arith.constant 5.000000e-01 : f32
    %152 = vector.broadcast %cst_55 : f32 to vector<8x384xf32>
    %153 = arith.mulf %152, %151 : vector<8x384xf32>
    %cst_56 = arith.constant 5.000000e-01 : f32
    %154 = vector.broadcast %cst_56 : f32 to vector<8x384xf32>
    %155 = arith.addf %153, %154 : vector<8x384xf32>
    %156 = vector.extract_strided_slice %155 {offsets = [0, 0], sizes = [8, 128], strides = [1, 1]} : vector<8x384xf32> to vector<8x128xf32>
    %157 = vector.extract_strided_slice %155 {offsets = [0, 128], sizes = [8, 128], strides = [1, 1]} : vector<8x384xf32> to vector<8x128xf32>
    %158 = vector.extract_strided_slice %155 {offsets = [0, 256], sizes = [8, 128], strides = [1, 1]} : vector<8x384xf32> to vector<8x128xf32>
    %159 = vector.extract_strided_slice %147 {offsets = [0, 384], sizes = [8, 128], strides = [1, 1]} : vector<8x512xf32> to vector<8x128xf32>
    %160 = math.tanh %159 : vector<8x128xf32>
    %161 = arith.mulf %157, %141 : vector<8x128xf32>
    %162 = arith.mulf %156, %160 : vector<8x128xf32>
    %163 = arith.addf %161, %162 : vector<8x128xf32>
    %164 = math.tanh %163 : vector<8x128xf32>
    %165 = arith.mulf %158, %164 : vector<8x128xf32>
    %c0_57 = arith.constant 0 : index
    %c0_58 = arith.constant 0 : index
    %166 = vector.load %arg2[%c0_57, %c0_58] : memref<128x512xf32, #tpu.memory_space<vmem>>, vector<128x512xf32>
    %cst_59 = arith.constant dense<0.000000e+00> : vector<8x512xf32>
    %167 = tpu.matmul %165, %166, %cst_59 {dimension_numbers = #tpu.dot_dimension_numbers<[1], [0], [0], [1], [0, 0, 1, 1], [], []>} : vector<8x128xf32>, vector<128x512xf32>, vector<8x512xf32> -> vector<8x512xf32>
    %c56 = arith.constant 56 : index
    %c0_60 = arith.constant 0 : index
    %168 = vector.load %arg5[%c56, %c0_60] : memref<72x512xf32, #tpu.memory_space<vmem>>, vector<8x512xf32>
    %169 = arith.addf %167, %168 : vector<8x512xf32>
    %170 = vector.extract_strided_slice %169 {offsets = [0, 0], sizes = [8, 384], strides = [1, 1]} : vector<8x512xf32> to vector<8x384xf32>
    %cst_61 = arith.constant 5.000000e-01 : f32
    %171 = vector.broadcast %cst_61 : f32 to vector<8x384xf32>
    %172 = arith.mulf %171, %170 : vector<8x384xf32>
    %173 = math.tanh %172 : vector<8x384xf32>
    %cst_62 = arith.constant 5.000000e-01 : f32
    %174 = vector.broadcast %cst_62 : f32 to vector<8x384xf32>
    %175 = arith.mulf %174, %173 : vector<8x384xf32>
    %cst_63 = arith.constant 5.000000e-01 : f32
    %176 = vector.broadcast %cst_63 : f32 to vector<8x384xf32>
    %177 = arith.addf %175, %176 : vector<8x384xf32>
    %178 = vector.extract_strided_slice %177 {offsets = [0, 0], sizes = [8, 128], strides = [1, 1]} : vector<8x384xf32> to vector<8x128xf32>
    %179 = vector.extract_strided_slice %177 {offsets = [0, 128], sizes = [8, 128], strides = [1, 1]} : vector<8x384xf32> to vector<8x128xf32>
    %180 = vector.extract_strided_slice %177 {offsets = [0, 256], sizes = [8, 128], strides = [1, 1]} : vector<8x384xf32> to vector<8x128xf32>
    %181 = vector.extract_strided_slice %169 {offsets = [0, 384], sizes = [8, 128], strides = [1, 1]} : vector<8x512xf32> to vector<8x128xf32>
    %182 = math.tanh %181 : vector<8x128xf32>
    %183 = arith.mulf %179, %163 : vector<8x128xf32>
    %184 = arith.mulf %178, %182 : vector<8x128xf32>
    %185 = arith.addf %183, %184 : vector<8x128xf32>
    %186 = math.tanh %185 : vector<8x128xf32>
    %187 = arith.mulf %180, %186 : vector<8x128xf32>
    %c0_64 = arith.constant 0 : index
    %c0_65 = arith.constant 0 : index
    %188 = vector.load %arg2[%c0_64, %c0_65] : memref<128x512xf32, #tpu.memory_space<vmem>>, vector<128x512xf32>
    %cst_66 = arith.constant dense<0.000000e+00> : vector<8x512xf32>
    %189 = tpu.matmul %187, %188, %cst_66 {dimension_numbers = #tpu.dot_dimension_numbers<[1], [0], [0], [1], [0, 0, 1, 1], [], []>} : vector<8x128xf32>, vector<128x512xf32>, vector<8x512xf32> -> vector<8x512xf32>
    %c64 = arith.constant 64 : index
    %c0_67 = arith.constant 0 : index
    %190 = vector.load %arg5[%c64, %c0_67] : memref<72x512xf32, #tpu.memory_space<vmem>>, vector<8x512xf32>
    %191 = arith.addf %189, %190 : vector<8x512xf32>
    %192 = vector.extract_strided_slice %191 {offsets = [0, 0], sizes = [8, 384], strides = [1, 1]} : vector<8x512xf32> to vector<8x384xf32>
    %cst_68 = arith.constant 5.000000e-01 : f32
    %193 = vector.broadcast %cst_68 : f32 to vector<8x384xf32>
    %194 = arith.mulf %193, %192 : vector<8x384xf32>
    %195 = math.tanh %194 : vector<8x384xf32>
    %cst_69 = arith.constant 5.000000e-01 : f32
    %196 = vector.broadcast %cst_69 : f32 to vector<8x384xf32>
    %197 = arith.mulf %196, %195 : vector<8x384xf32>
    %cst_70 = arith.constant 5.000000e-01 : f32
    %198 = vector.broadcast %cst_70 : f32 to vector<8x384xf32>
    %199 = arith.addf %197, %198 : vector<8x384xf32>
    %200 = vector.extract_strided_slice %199 {offsets = [0, 0], sizes = [8, 128], strides = [1, 1]} : vector<8x384xf32> to vector<8x128xf32>
    %201 = vector.extract_strided_slice %199 {offsets = [0, 128], sizes = [8, 128], strides = [1, 1]} : vector<8x384xf32> to vector<8x128xf32>
    %202 = vector.extract_strided_slice %199 {offsets = [0, 256], sizes = [8, 128], strides = [1, 1]} : vector<8x384xf32> to vector<8x128xf32>
    %203 = vector.extract_strided_slice %191 {offsets = [0, 384], sizes = [8, 128], strides = [1, 1]} : vector<8x512xf32> to vector<8x128xf32>
    %204 = math.tanh %203 : vector<8x128xf32>
    %205 = arith.mulf %201, %185 : vector<8x128xf32>
    %206 = arith.mulf %200, %204 : vector<8x128xf32>
    %207 = arith.addf %205, %206 : vector<8x128xf32>
    %208 = math.tanh %207 : vector<8x128xf32>
    %209 = arith.mulf %202, %208 : vector<8x128xf32>
    %c0_71 = arith.constant 0 : index
    %c0_72 = arith.constant 0 : index
    %210 = vector.load %arg3[%c0_71, %c0_72] : memref<136x24xf32, #tpu.memory_space<vmem>>, vector<128x24xf32>
    %cst_73 = arith.constant dense<0.000000e+00> : vector<8x24xf32>
    %211 = tpu.matmul %209, %210, %cst_73 {dimension_numbers = #tpu.dot_dimension_numbers<[1], [0], [0], [1], [0, 0, 1, 1], [], []>} : vector<8x128xf32>, vector<128x24xf32>, vector<8x24xf32> -> vector<8x24xf32>
    %c128 = arith.constant 128 : index
    %c0_74 = arith.constant 0 : index
    %212 = vector.load %arg3[%c128, %c0_74] : memref<136x24xf32, #tpu.memory_space<vmem>>, vector<1x24xf32>
    %213 = vector.broadcast %212 : vector<1x24xf32> to vector<8x24xf32>
    %214 = arith.addf %211, %213 : vector<8x24xf32>
    %cst_75 = arith.constant dense<0xFF800000> : vector<8xf32>
    %215 = vector.multi_reduction <maximumf>, %214, %cst_75 [1] : vector<8x24xf32> to vector<8xf32>
    %216 = vector.shape_cast %215 : vector<8xf32> to vector<8x1xf32>
    %217 = vector.broadcast %216 : vector<8x1xf32> to vector<8x24xf32>
    %218 = arith.subf %214, %217 : vector<8x24xf32>
    %219 = math.exp %218 : vector<8x24xf32>
    %cst_76 = arith.constant dense<0.000000e+00> : vector<8xf32>
    %220 = vector.multi_reduction <add>, %219, %cst_76 [1] : vector<8x24xf32> to vector<8xf32>
    %221 = vector.shape_cast %220 : vector<8xf32> to vector<8x1xf32>
    %222 = math.log %221 : vector<8x1xf32>
    %223 = vector.broadcast %222 : vector<8x1xf32> to vector<8x24xf32>
    %224 = arith.subf %218, %223 : vector<8x24xf32>
    %225 = vector.extract_strided_slice %224 {offsets = [0, 0], sizes = [2, 24], strides = [1, 1]} : vector<8x24xf32> to vector<2x24xf32>
    %c0_77 = arith.constant 0 : index
    %c0_78 = arith.constant 0 : index
    %226 = vector.load %arg4[%c0_77, %c0_78] : memref<2x24xf32, #tpu.memory_space<vmem>>, vector<2x24xf32>
    tpu.vector_store %arg4[%c0_77, %c0_78], %225 {strides = array<i32>} : memref<2x24xf32, #tpu.memory_space<vmem>>, vector<2x24xf32>,
    return
  }
}

</mosaic_0001>

<bundles_post_ra>
// kernel: lstm_forward.1
= control target key start
LH: loop header
LB: loop body
LE: loop exit
PB: predicated region body
PF: predicated region fallthrough
CT: control target
= control target key end

     0   :  { %9 = vsyncpa [#allocation4], 0  ;;  %s3369_s0 = inlined_call_operand.vmem [shape: f32[72,24], index: 0, kind: input, shape index: {}]   ;;  %s3370_s1 = inlined_call_operand.vmem [shape: f32[32,512], index: 1, kind: input, shape index: {}]   ;;  %s3371_s2 = inlined_call_operand.hbm [shape: f32[128,512], index: 2, kind: input, shape index: {}]   ;;  %s3372_s3 = inlined_call_operand.vmem [shape: f32[136,24], index: 3, kind: input, shape index: {}]   ;;  %s3373_s4 = inlined_call_operand.hbm [shape: f32[2,24], index: 4, kind: output, shape index: {}]  }
   0x1   :  { %10 = vsyncpa [#allocation5], 0  ;;  %s2736_s15 = smov [#allocation3]   ;;  %s2688_s19 = scalar_lea.hbm %s3371_s2, 8192 }
   0x2   :  { %s20_s16 = sshll.u32 %s2736_s15, 4  ;;  %p2689_p0 = scmp.ne.s32.totalorder %s3371_s2, %s2688_s19  ;;  %s21_s16 = int_to_ptr.vmem [resolvable:$true] %s20_s16 }
   0x3   :  { %p2692_p1 = scmp.lt.u32.totalorder %s2688_s19, %s3371_s2 }
   0x5   :  { %p2694_p2 = pnand %p2692_p1, %p2689_p0 }
   0x7   :  { %2697 = shalt.err (!%p2694_p2)
}
   0x8   :  { %s2698_s24 = scalar_lea.vmem %s21_s16, 8192  ;;  %p2703_p4 = scmp.lt.s32.totalorder %s21_s16, %s21_s16 }
   0x9   :  { %p2699_p3 = scmp.ne.s32.totalorder %s21_s16, %s2698_s24  ;;  %p2704_p5 = scmp.lt.s32.totalorder %s2698_s24, %s2698_s24 }
   0xb   :  { %p2705_p6 = por %p2704_p5, %p2703_p4 }
   0xd   :  { %p2706_p7 = pnand %p2705_p6, %p2699_p3 }
   0xf   :  { %2709 = shalt.err (!%p2706_p7)
}
  0x10   :  { %s2737_s25 = smov 512   ;;  %s2738_s26 = smov 32  }
  0x11   :  { %26 = dma.hbm_to_vmem [thread:$0]  %s3371_s2, 8192, %s21_s16, [#allocation4], %s2737_s25, %s2737_s25, %s2738_s26  }
  0x12   :  { %2732 = dma.done.wait [#allocation4], 8192  }
  0x13   :  { %2733 = vsyncadd [#allocation4], 4294959104  ;;  %v2739_v0 = vmov 0.0   ;;  %v42_v1 = vld [vmem:[%s3370_s1 + $0x8] sm:$0xff]  ;;  %v41_v3 = vld [vmem:[%s3370_s1] sm:$0xff]  ;;  %vm76_vm0 = vcmask 195584  }
  0x14   :  { %168 = vmatprep.mubr.f32.mxu0 %v2739_v0  ;;  %216 = vmatprep.mubr.f32.mxu1 %v2739_v0  ;;  %v46_v2 = vld [vmem:[%s3370_s1 + $0x28] sm:$0xff]  ;;  %v45_v5 = vld [vmem:[%s3370_s1 + $0x20] sm:$0xff]  ;;  %v44_v8 = vld [vmem:[%s3370_s1 + $0x18] sm:$0xff]  ;;  %vm2741_vm2 = vmmov 0   ;;  %s2742_s22 = smov [#allocation6]   ;;  %vm1884_vm3 = vcmask 189440  }
  0x15   :  { %v1975_v4 = vpack.c.bf16 %v46_v2, %v42_v1  ;;  %v1977_v6 = vpack.c.bf16 %v45_v5, %v41_v3  ;;  %v50_v7 = vld [vmem:[%s3370_s1 + $0x48] sm:$0xff]  ;;  %v48_v9 = vld [vmem:[%s3370_s1 + $0x38] sm:$0xff]  ;;  %v43_v10 = vld [vmem:[%s3370_s1 + $0x10] sm:$0xff]  ;;  %s1892_s23 = sshll.u32 %s2742_s22, 4  ;;  %s1893_s23 = int_to_ptr.vmem [resolvable:$true] %s1892_s23 }
  0x16   :  { %v47_v11 = vld [vmem:[%s3370_s1 + $0x30] sm:$0xff]  ;;  %v49_v12 = vld [vmem:[%s3370_s1 + $0x40] sm:$0xff]  ;;  %v1979_v15 = vpack.c.bf16 %v48_v9, %v44_v8  ;;  %v52_v17 = vld [vmem:[%s3370_s1 + $0x58] sm:$0xff]  ;;  %p2715_p9 = scmp.lt.s32.totalorder %s1893_s23, %s1893_s23 }
  0x17   :  { %1976 = vmatprep.subr.bf16.mxu0 %v1975_v4  ;;  %2519 = vmatprep.subr.bf16.mxu1 %v1975_v4  ;;  %v32_v13 = vld [vmem:[%s3369_s0] sm:$0xff]  ;;  %v1981_v16 = vpack.c.bf16 %v47_v11, %v43_v10  ;;  %v51_v18 = vld [vmem:[%s3370_s1 + $0x50] sm:$0xff]  ;;  %v406_v19 = vld [vmem:[#allocation3 + $0x8] sm:$0xff] }
  0x18   :  { %1978 = vmatpush1.bf16.msra.mxu0 %v1977_v6  ;;  %2521 = vmatpush1.bf16.msra.mxu1 %v1977_v6  ;;  %v2818_v14 = vld [vmem:[%s3369_s0 + $0x40] sm:$0xff]  ;;  %v410_v20 = vld [vmem:[#allocation3 + $0x28] sm:$0xff]  ;;  %v408_v21 = vld [vmem:[#allocation3 + $0x18] sm:$0xff] }
  0x19   :  { %108 = vmatprep.subr.mxu0 %v50_v7  ;;  %2520 = vmatprep.subr.mxu1 %v50_v7  ;;  %v2833_v22 = vpack.c.bf16 %v410_v20, %v406_v19  ;;  %v412_v23 = vld [vmem:[#allocation3 + $0x38] sm:$0xff]  ;;  %v405_v24 = vld [vmem:[#allocation3] sm:$0xff]  ;;  %v33_v26 = vld [vmem:[%s3369_s0 + $0x8] sm:$0xff] }
  0x1a   :  { %v409_v25 = vld [vmem:[#allocation3 + $0x20] sm:$0xff]  ;;  %v2838_v27 = vpack.c.bf16 %v412_v23, %v408_v21  ;;  %v407_v29 = vld [vmem:[#allocation3 + $0x10] sm:$0xff]  ;;  %v414_v32 = vld [vmem:[#allocation3 + $0x48] sm:$0xff] }
  0x1b   :  { %v2840_v28 = vpack.c.bf16 %v409_v25, %v405_v24  ;;  %v411_v30 = vld [vmem:[#allocation3 + $0x30] sm:$0xff]  ;;  %v418_v33 = vld [vmem:[#allocation3 + $0x68] sm:$0xff]  ;;  %v416_v34 = vld [vmem:[#allocation3 + $0x58] sm:$0xff] }
  0x1c   :  { %109 = vmatpush1.msra.mxu0 %v49_v12  ;;  %2522 = vmatpush1.msra.mxu1 %v49_v12  ;;  %v2844_v31 = vpack.c.bf16 %v411_v30, %v407_v29  ;;  %v2850_v35 = vpack.c.bf16 %v418_v33, %v414_v32  ;;  %v420_v36 = vld [vmem:[#allocation3 + $0x78] sm:$0xff]  ;;  %v413_v37 = vld [vmem:[#allocation3 + $0x40] sm:$0xff]  ;;  %v34_v39 = vld [vmem:[%s3369_s0 + $0x10] sm:$0xff] }
  0x1d   :  { %1902 = vmatmul.mubr.msk.f32.vlgmr.msra.gmra.mrb[0].mxu0 %vm76_vm0, %v32_v13  ;;  %1910 = vmatmul.mubr.msk.f32.vlgmr.msra.gmra.mrb[0].mxu1 %vm76_vm0, %v2818_v14  ;;  %v417_v38 = vld [vmem:[#allocation3 + $0x60] sm:$0xff]  ;;  %v2856_v40 = vpack.c.bf16 %v420_v36, %v416_v34  ;;  %v415_v42 = vld [vmem:[#allocation3 + $0x50] sm:$0xff]  ;;  %v422_v45 = vld [vmem:[#allocation3 + $0x88] sm:$0xff] }
  0x1e   :  { %1980 = vmatprep.subr.bf16.mxu1 %v1979_v15  ;;  %287 = vmatprep.mubr.f32.mxu1 %v2739_v0  ;;  %v2858_v41 = vpack.c.bf16 %v417_v38, %v413_v37  ;;  %v419_v43 = vld [vmem:[#allocation3 + $0x70] sm:$0xff]  ;;  %v426_v46 = vld [vmem:[#allocation3 + $0xa8] sm:$0xff]  ;;  %v424_v47 = vld [vmem:[#allocation3 + $0x98] sm:$0xff] }
  0x1f   :  { %1982 = vmatpush1.bf16.msra.mxu1 %v1981_v16  ;;  %174 = vmatprep.mubr.f32.mxu0 %v2739_v0  ;;  %v2862_v44 = vpack.c.bf16 %v419_v43, %v415_v42  ;;  %v2868_v48 = vpack.c.bf16 %v426_v46, %v422_v45  ;;  %v428_v49 = vld [vmem:[#allocation3 + $0xb8] sm:$0xff]  ;;  %v421_v50 = vld [vmem:[#allocation3 + $0x80] sm:$0xff]  ;;  %v423_v55 = vld [vmem:[#allocation3 + $0x90] sm:$0xff] }
  0x20   :  { %227 = vmatprep.subr.mxu1 %v52_v17  ;;  %1984 = vmatprep.subr.bf16.mxu0 %v2833_v22  ;;  %v425_v51 = vld [vmem:[#allocation3 + $0xa0] sm:$0xff]  ;;  %v35_v52 = vld [vmem:[%s3369_s0 + $0x18] sm:$0xff]  ;;  %v2875_v53 = vpack.c.bf16 %v428_v49, %v424_v47  ;;  %v427_v56 = vld [vmem:[#allocation3 + $0xb0] sm:$0xff] }
  0x21   :  { %1986 = vmatpush1.bf16.msra.mxu0 %v2840_v28  ;;  %v2877_v54 = vpack.c.bf16 %v425_v51, %v421_v50  ;;  %v2881_v57 = vpack.c.bf16 %v427_v56, %v423_v55  ;;  %v430_v58 = vld [vmem:[#allocation3 + $0xc8] sm:$0xff]  ;;  %v432_v60 = vld [vmem:[#allocation3 + $0xd8] sm:$0xff]  ;;  %v429_v63 = vld [vmem:[#allocation3 + $0xc0] sm:$0xff] }
  0x22   :  { %1903 = vmatmul.mubr.msk.f32.gmra.mrb[2].mxu0 %vm76_vm0, %v33_v26  ;;  %1988 = vmatprep.subr.bf16.mxu0 %v2850_v35  ;;  %v434_v59 = vld [vmem:[#allocation3 + $0xe8] sm:$0xff]  ;;  %v436_v62 = vld [vmem:[#allocation3 + $0xf8] sm:$0xff]  ;;  %v433_v1 = vld [vmem:[#allocation3 + $0xe0] sm:$0xff] }
  0x23   :  { %228 = vmatpush1.msra.mxu1 %v51_v18  ;;  %180 = vmatprep.mubr.f32.mxu0 %v2739_v0  ;;  %v2887_v61 = vpack.c.bf16 %v434_v59, %v430_v58  ;;  %v36_v2 = vld [vmem:[%s3369_s0 + $0x20] sm:$0xff]  ;;  %v2894_v3 = vpack.c.bf16 %v436_v62, %v432_v60  ;;  %v2896_v4 = vpack.c.bf16 %v433_v1, %v429_v63  ;;  %v431_v5 = vld [vmem:[#allocation3 + $0xd0] sm:$0xff]  ;;  %v438_v8 = vld [vmem:[#allocation3 + $0x108] sm:$0xff] }
  0x24   :  { %1911 = vmatmul.mubr.msk.f32.vlgmr.msra.gmra.mrb[2].mxu1 %vm76_vm0, %v32_v13  ;;  %2016 = vmatprep.subr.bf16.mxu1 %v2838_v27  ;;  %v435_v6 = vld [vmem:[#allocation3 + $0xf0] sm:$0xff]  ;;  %v442_v9 = vld [vmem:[#allocation3 + $0x128] sm:$0xff]  ;;  %v440_v10 = vld [vmem:[#allocation3 + $0x118] sm:$0xff] }
  0x25   :  { %293 = vmatprep.mubr.f32.mxu1 %v2739_v0  ;;  %2018 = vmatpush1.bf16.msra.mxu1 %v2844_v31  ;;  %v2900_v7 = vpack.c.bf16 %v435_v6, %v431_v5  ;;  %v2906_v11 = vpack.c.bf16 %v442_v9, %v438_v8  ;;  %v444_v12 = vld [vmem:[#allocation3 + $0x138] sm:$0xff]  ;;  %v437_v13 = vld [vmem:[#allocation3 + $0x100] sm:$0xff]  ;;  %v37_v16 = vld [vmem:[%s3369_s0 + $0x28] sm:$0xff] }
  0x26   :  { %2020 = vmatprep.subr.bf16.mxu1 %v2856_v40  ;;  %1990 = vmatpush1.bf16.msra.mxu0 %v2858_v41  ;;  %v441_v15 = vld [vmem:[#allocation3 + $0x120] sm:$0xff]  ;;  %v2913_v17 = vpack.c.bf16 %v444_v12, %v440_v10  ;;  %v439_v19 = vld [vmem:[#allocation3 + $0x110] sm:$0xff]  ;;  %v446_v23 = vld [vmem:[#allocation3 + $0x148] sm:$0xff] }
  0x27   :  { %1904 = vmatmul.mubr.msk.f32.gmra.mrb[4].mxu0 %vm76_vm0, %v34_v39  ;;  %1992 = vmatprep.subr.bf16.mxu0 %v2868_v48  ;;  %v2915_v18 = vpack.c.bf16 %v441_v15, %v437_v13  ;;  %v443_v20 = vld [vmem:[#allocation3 + $0x130] sm:$0xff]  ;;  %v450_v24 = vld [vmem:[#allocation3 + $0x168] sm:$0xff]  ;;  %v448_v25 = vld [vmem:[#allocation3 + $0x158] sm:$0xff]  ;;  %v56_v15 = vlaneseq }
  0x28   :  { %1912 = vmatmul.mubr.msk.f32.gmra.mrb[4].mxu1 %vm76_vm0, %v33_v26  ;;  %186 = vmatprep.mubr.f32.mxu0 %v2739_v0  ;;  %v2919_v21 = vpack.c.bf16 %v443_v20, %v439_v19  ;;  %v2925_v26 = vpack.c.bf16 %v450_v24, %v446_v23  ;;  %v452_v29 = vld [vmem:[#allocation3 + $0x178] sm:$0xff]  ;;  %v445_v30 = vld [vmem:[#allocation3 + $0x140] sm:$0xff]  ;;  %v38_v33 = vld [vmem:[%s3369_s0 + $0x30] sm:$0xff] }
  0x29   :  { %299 = vmatprep.mubr.f32.mxu1 %v2739_v0  ;;  %2022 = vmatpush1.bf16.msra.mxu1 %v2862_v44  ;;  %v449_v32 = vld [vmem:[#allocation3 + $0x160] sm:$0xff]  ;;  %v2932_v34 = vpack.c.bf16 %v452_v29, %v448_v25  ;;  %v447_v37 = vld [vmem:[#allocation3 + $0x150] sm:$0xff]  ;;  %v39_v42 = vld [vmem:[%s3369_s0 + $0x38] sm:$0xff] }
  0x2a   :  { %2024 = vmatprep.subr.bf16.mxu1 %v2875_v53  ;;  %1994 = vmatpush1.bf16.msra.mxu0 %v2877_v54  ;;  %v2934_v36 = vpack.c.bf16 %v449_v32, %v445_v30  ;;  %v451_v38 = vld [vmem:[#allocation3 + $0x170] sm:$0xff]  ;;  %v454_v43 = vld [vmem:[#allocation3 + $0x188] sm:$0xff]  ;;  %v456_v47 = vld [vmem:[#allocation3 + $0x198] sm:$0xff] }
  0x2b   :  { %1905 = vmatmul.mubr.msk.f32.gmra.mrb[6].mxu0 %vm76_vm0, %v35_v52  ;;  %1996 = vmatprep.subr.bf16.mxu0 %v2887_v61  ;;  %v458_v45 = vld [vmem:[#allocation3 + $0x1a8] sm:$0xff]  ;;  %v460_v49 = vld [vmem:[#allocation3 + $0x1b8] sm:$0xff]  ;;  %v453_v50 = vld [vmem:[#allocation3 + $0x180] sm:$0xff] }
  0x2c   :  { %1913 = vmatmul.mubr.msk.f32.gmra.mrb[6].mxu1 %vm76_vm0, %v34_v39  ;;  %192 = vmatprep.mubr.f32.mxu0 %v2739_v0  ;;  %v2938_v39 = vpack.c.bf16 %v451_v38, %v447_v37  ;;  %v2945_v46 = vpack.c.bf16 %v458_v45, %v454_v43  ;;  %v2949_v51 = vpack.c.bf16 %v460_v49, %v456_v47  ;;  %v455_v55 = vld [vmem:[#allocation3 + $0x190] sm:$0xff]  ;;  %v462_v60 = vld [vmem:[#allocation3 + $0x1c8] sm:$0xff]  ;;  %v464_v63 = vld [vmem:[#allocation3 + $0x1d8] sm:$0xff] }
  0x2d   :  { %305 = vmatprep.mubr.f32.mxu1 %v2739_v0  ;;  %2026 = vmatpush1.bf16.msra.mxu1 %v2881_v57  ;;  %v459_v56 = vld [vmem:[#allocation3 + $0x1b0] sm:$0xff]  ;;  %v466_v62 = vld [vmem:[#allocation3 + $0x1e8] sm:$0xff]  ;;  %v461_v5 = vld [vmem:[#allocation3 + $0x1c0] sm:$0xff] }
  0x2e   :  { %2028 = vmatprep.subr.bf16.mxu1 %v2894_v3  ;;  %1998 = vmatpush1.bf16.msra.mxu0 %v2896_v4  ;;  %v2955_v59 = vpack.c.bf16 %v459_v56, %v455_v55  ;;  %v2959_v1 = vpack.c.bf16 %v466_v62, %v462_v60  ;;  %v465_v6 = vld [vmem:[#allocation3 + $0x1e0] sm:$0xff]  ;;  %v463_v10 = vld [vmem:[#allocation3 + $0x1d0] sm:$0xff] }
  0x2f   :  { %1906 = vmatmul.mubr.msk.f32.gmra.mrb[8].mxu0 %vm76_vm0, %v36_v2  ;;  %2000 = vmatprep.subr.bf16.mxu0 %v2906_v11  ;;  %v2965_v9 = vpack.c.bf16 %v465_v6, %v461_v5  ;;  %v467_v12 = vld [vmem:[#allocation3 + $0x1f0] sm:$0xff] }
  0x30   :  { %1914 = vmatmul.mubr.msk.f32.gmra.mrb[8].mxu1 %vm76_vm0, %v35_v52  ;;  %198 = vmatprep.mubr.f32.mxu0 %v2739_v0  ;;  %v457_v52 = vld [vmem:[#allocation3 + $0x1a0] sm:$0xff]  ;;  %v2969_v13 = vpack.c.bf16 %v467_v12, %v463_v10  ;;  %v401_v12 = vand.u32 127, %v56_v15 }
  0x31   :  { %311 = vmatprep.mubr.f32.mxu1 %v2739_v0  ;;  %2030 = vmatpush1.bf16.msra.mxu1 %v2900_v7  ;;  %v2953_v58 = vpack.c.bf16 %v457_v52, %v453_v50 }
  0x32   :  { %2032 = vmatprep.subr.bf16.mxu1 %v2913_v17  ;;  %2002 = vmatpush1.bf16.msra.mxu0 %v2915_v18  ;;  %vm402_vm1 = vcmp.lt.s32.totalorder %v401_v12, 64 }
  0x33   :  { %1907 = vmatmul.mubr.msk.f32.gmra.mrb[10].mxu0 %vm76_vm0, %v37_v16  ;;  %2004 = vmatprep.subr.bf16.mxu0 %v2925_v26 }
  0x34   :  { %1915 = vmatmul.mubr.msk.f32.gmra.mrb[10].mxu1 %vm76_vm0, %v36_v2  ;;  %204 = vmatprep.mubr.f32.mxu0 %v2739_v0  ;;  %v468_v2 = vld [vmem:[#allocation3 + $0x1f8] sm:$0xff] }
  0x35   :  { %317 = vmatprep.mubr.f32.mxu1 %v2739_v0  ;;  %2034 = vmatpush1.bf16.msra.mxu1 %v2919_v21  ;;  %v2963_v8 = vpack.c.bf16 %v468_v2, %v464_v63 }
  0x36   :  { %2036 = vmatprep.subr.bf16.mxu1 %v2932_v34  ;;  %2006 = vmatpush1.bf16.msra.mxu0 %v2934_v36 }
  0x37   :  { %1908 = vmatmul.mubr.msk.f32.gmra.mrb[12].mxu0 %vm76_vm0, %v38_v33  ;;  %2008 = vmatprep.subr.bf16.mxu0 %v2945_v46 }
  0x38   :  { %1916 = vmatmul.mubr.msk.f32.gmra.mrb[12].mxu1 %vm76_vm0, %v37_v16  ;;  %210 = vmatprep.mubr.f32.mxu0 %v2739_v0  ;;  %v57_v16 = vshrl.u32 %v56_v15, 7 }
  0x39   :  { %323 = vmatprep.mubr.f32.mxu1 %v2739_v0  ;;  %2038 = vmatpush1.bf16.msra.mxu1 %v2938_v39 }
  0x3a   :  { %2040 = vmatprep.subr.bf16.mxu1 %v2949_v51  ;;  %2010 = vmatpush1.bf16.msra.mxu0 %v2953_v58  ;;  %v58_v19 = vsub.s32 0, %v57_v16  ;;  %v62_v20 = vsub.s32 1, %v57_v16  ;;  %v70_v37 = vsub.s32 3, %v57_v16 }
  0x3b   :  { %1909 = vmatmul.mubr.msk.f32.gmra.mrb[14].mxu0 %vm76_vm0, %v39_v42  ;;  %2012 = vmatprep.subr.bf16.mxu0 %v2959_v1 }
  0x3c   :  { %1917 = vmatmul.mubr.msk.f32.gmra.mrb[14].mxu1 %vm76_vm0, %v38_v33  ;;  %537 = vmatprep.mubr.f32.mxu0 %v2739_v0 }
  0x3d   :  { %329 = vmatprep.mubr.f32.mxu1 %v2739_v0  ;;  %2042 = vmatpush1.bf16.msra.mxu1 %v2955_v59 }
  0x3e   :  { %2044 = vmatprep.subr.bf16.mxu1 %v2963_v8  ;;  %2014 = vmatpush1.bf16.msra.mxu0 %v2965_v9 }
  0x3f   :  { %2048 = vmatprep.subr.bf16.mxu0 %v2833_v22 }
  0x40   :  { %1918 = vmatmul.mubr.msk.f32.gmra.mrb[16].mxu1 %vm76_vm0, %v39_v42  ;;  %v66_v42 = vsub.s32 2, %v57_v16 }
  0x41   :  { %335 = vmatprep.mubr.f32.mxu1 %v2739_v0  ;;  %2046 = vmatpush1.bf16.msra.mxu1 %v2969_v13 }
  0x42   :  { %2080 = vmatprep.subr.bf16.mxu1 %v2838_v27 }
  0x44   :  { %1919 = vmatmul.mubr.msk.f32.gmra.mrb[18].mxu1 %vm76_vm0, %v2818_v14  ;;  %v1901_v14 = vld [vmem:[%s3370_s1 + $0x60] ss:$8 sm:$0xf] }
  0x45   :  { %608 = vmatprep.mubr.f32.mxu1 %v2739_v0  ;;  %v2986_v23 = vrot.slane %v1901_v14, %v58_v19  ;;  %v2988_v24 = vrot.slane %v1901_v14, %v62_v20  ;;  %v2996_v47 = vrot.slane %v1901_v14, %v70_v37  ;;  %v2998_v49 = vrot.slane %v1901_v14, %v66_v42 }
  0xf0   :  { %v170_v25 = vpop.f32.mrb[0].mxu0  ;;  %v2990_v29 = vpop.f32.mrb[0].mxu1 }
  0xf1   :  { %v171_v30 = vadd.f32 %v170_v25, %v2986_v23  ;;  %v172_v32 = vpop.f32.mrb[1].mxu0  ;;  %v2993_v33 = vpop.f32.mrb[1].mxu1 }
  0xf2   :  { %v173_v38 = vadd.f32 %v172_v32, %v2988_v24 }
  0xf3   :  { %v382_v43 = vmul.f32 0.5, %v171_v30 }
  0xf4   :  { %v383_v45 = vmul.f32 0.5, %v173_v38 }
  0xf5   :  { %2594 = vtanh.f32 %v382_v43 }
  0xf6   :  { %2596 = vtanh.f32 %v383_v45 }
  0xf7   :  { %v289_v50 = vpop.f32.mrb[2].mxu1 }
  0xf8   :  { %v291_v52 = vpop.f32.mrb[3].mxu1  ;;  %v290_v56 = vadd.f32 %v289_v50, %v2998_v49 }
  0xf9   :  { %v292_v55 = vadd.f32 %v291_v52, %v2996_v47 }
  0xfa   :  { %v384_v60 = vmul.f32 0.5, %v290_v56 }
  0xfb   :  { %2598 = vtanh.f32 %v292_v55 }
  0xfc   :  { %2600 = vtanh.f32 %v384_v60 }
  0xff   :  { %v2595_v62 = vpop.eup %2594 }
 0x100   :  { %v2597_v63 = vpop.eup %2596  ;;  %v388_v2 = vmul.f32 0.5, %v2595_v62 }
 0x101   :  { %v389_v5 = vmul.f32 0.5, %v2597_v63 }
 0x102   :  { %v391_v6 = vadd.f32 0.5, %v388_v2 }
 0x103   :  { %v392_v10 = vadd.f32 0.5, %v389_v5 }
 0x105   :  { %v2599_v16 = vpop.eup %2598  ;;  %v395_v19 = vmul.f32 0.0, %v392_v10 }
 0x106   :  { %v396_v14 = vmul.f32 %v2599_v16, %v391_v6  ;;  %v2601_v30 = vpop.eup %2600 }
 0x107   :  { %v390_v32 = vmul.f32 0.5, %v2601_v30 }
 0x108   :  { %v397_v20 = vadd.f32 %v396_v14, %v395_v19 }
 0x109   :  { %v393_v37 = vadd.f32 0.5, %v390_v32 }
 0x10a   :  { %2602 = vtanh.f32 %v397_v20  ;;  %v3002_v25 = vsel %vm402_vm1, %v397_v20, 0.0 }
 0x114   :  { %v2603_v38 = vpop.eup %2602 }
 0x115   :  { %v399_v42 = vmul.f32 %v2603_v38, %v393_v37 }
 0x117   :  { %1920 = vmatmul.mubr.msk.f32.vlgmr.msra.gmra.mrb[2].mxu0 %vm402_vm1, %v399_v42  ;;  %1921 = vmatmul.mubr.msk.f32.vlgmr.msra.gmra.mrb[4].mxu1 %vm402_vm1, %v399_v42 }
 0x118   :  { %2050 = vmatpush1.bf16.msra.mxu0 %v2840_v28  ;;  %2082 = vmatpush1.bf16.msra.mxu1 %v2844_v31 }
 0x119   :  { %2052 = vmatprep.subr.bf16.mxu0 %v2850_v35  ;;  %2084 = vmatprep.subr.bf16.mxu1 %v2856_v40 }
 0x11a   :  { %701 = vmatprep.mubr.f32.mxu0 %v2739_v0  ;;  %772 = vmatprep.mubr.f32.mxu1 %v2739_v0 }
 0x11c   :  { %2054 = vmatpush1.bf16.msra.mxu0 %v2858_v41  ;;  %2086 = vmatpush1.bf16.msra.mxu1 %v2862_v44 }
 0x11d   :  { %2056 = vmatprep.subr.bf16.mxu0 %v2868_v48  ;;  %2088 = vmatprep.subr.bf16.mxu1 %v2875_v53 }
 0x120   :  { %2058 = vmatpush1.bf16.msra.mxu0 %v2877_v54  ;;  %2090 = vmatpush1.bf16.msra.mxu1 %v2881_v57 }
 0x121   :  { %2060 = vmatprep.subr.bf16.mxu0 %v2887_v61  ;;  %2092 = vmatprep.subr.bf16.mxu1 %v2894_v3 }
 0x124   :  { %2062 = vmatpush1.bf16.msra.mxu0 %v2896_v4  ;;  %2094 = vmatpush1.bf16.msra.mxu1 %v2900_v7 }
 0x125   :  { %2064 = vmatprep.subr.bf16.mxu0 %v2906_v11  ;;  %2096 = vmatprep.subr.bf16.mxu1 %v2913_v17 }
 0x128   :  { %2066 = vmatpush1.bf16.msra.mxu0 %v2915_v18  ;;  %2098 = vmatpush1.bf16.msra.mxu1 %v2919_v21 }
 0x129   :  { %2068 = vmatprep.subr.bf16.mxu0 %v2925_v26  ;;  %2100 = vmatprep.subr.bf16.mxu1 %v2932_v34 }
 0x12c   :  { %2070 = vmatpush1.bf16.msra.mxu0 %v2934_v36  ;;  %2102 = vmatpush1.bf16.msra.mxu1 %v2938_v39 }
 0x12d   :  { %2072 = vmatprep.subr.bf16.mxu0 %v2945_v46  ;;  %2104 = vmatprep.subr.bf16.mxu1 %v2949_v51 }
 0x130   :  { %2074 = vmatpush1.bf16.msra.mxu0 %v2953_v58  ;;  %2106 = vmatpush1.bf16.msra.mxu1 %v2955_v59 }
 0x131   :  { %2076 = vmatprep.subr.bf16.mxu0 %v2959_v1  ;;  %2108 = vmatprep.subr.bf16.mxu1 %v2963_v8 }
 0x134   :  { %2078 = vmatpush1.bf16.msra.mxu0 %v2965_v9  ;;  %2110 = vmatpush1.bf16.msra.mxu1 %v2969_v13 }
 0x135   :  { %2112 = vmatprep.subr.bf16.mxu0 %v2833_v22  ;;  %2144 = vmatprep.subr.bf16.mxu1 %v2838_v27 }
 0x1ea   :  { %v539_v15 = vpop.f32.mrb[2].mxu0  ;;  %v610_v43 = vpop.f32.mrb[4].mxu1 }
 0x1eb   :  { %v2523_v45 = vadd.f32 %v539_v15, %v2986_v23  ;;  %v541_v50 = vpop.f32.mrb[3].mxu0  ;;  %v612_v52 = vpop.f32.mrb[5].mxu1  ;;  %v2541_v63 = vadd.f32 %v610_v43, %v2998_v49 }
 0x1ec   :  { %v2524_v55 = vadd.f32 %v541_v50, %v2988_v24  ;;  %v2542_v62 = vadd.f32 %v612_v52, %v2996_v47 }
 0x1ed   :  { %v615_v56 = vmul.f32 0.5, %v2523_v45  ;;  %v617_v2 = vmul.f32 0.5, %v2541_v63 }
 0x1ee   :  { %v616_v60 = vmul.f32 0.5, %v2524_v55 }
 0x1ef   :  { %2604 = vtanh.f32 %v615_v56 }
 0x1f0   :  { %2606 = vtanh.f32 %v616_v60 }
 0x1f1   :  { %2608 = vtanh.f32 %v2542_v62 }
 0x1f2   :  { %2610 = vtanh.f32 %v617_v2 }
 0x1f9   :  { %v2605_v5 = vpop.eup %2604 }
 0x1fa   :  { %v621_v6 = vmul.f32 0.5, %v2605_v5  ;;  %v2607_v10 = vpop.eup %2606 }
 0x1fb   :  { %v622_v16 = vmul.f32 0.5, %v2607_v10  ;;  %v2609_v19 = vpop.eup %2608 }
 0x1fc   :  { %v624_v12 = vadd.f32 0.5, %v621_v6  ;;  %v2611_v37 = vpop.eup %2610 }
 0x1fd   :  { %v625_v14 = vadd.f32 0.5, %v622_v16  ;;  %v623_v38 = vmul.f32 0.5, %v2611_v37 }
 0x1fe   :  { %v629_v20 = vmul.f32 %v2609_v19, %v624_v12 }
 0x1ff   :  { %v628_v30 = vmul.f32 %v625_v14, %v3002_v25  ;;  %v626_v42 = vadd.f32 0.5, %v623_v38 }
 0x201   :  { %v3043_v32 = vadd.f32 %v629_v20, %v628_v30 }
 0x203   :  { %2612 = vtanh.f32 %v3043_v32 }
 0x20d   :  { %v2613_v15 = vpop.eup %2612 }
 0x20e   :  { %v632_v43 = vmul.f32 %v2613_v15, %v626_v42 }
 0x210   :  { %702 = vmatmul.mubr.f32.vlgmr.msra.gmra.mrb[4].mxu0 %v632_v43  ;;  %773 = vmatmul.mubr.f32.vlgmr.msra.gmra.mrb[6].mxu1 %v632_v43 }
 0x211   :  { %2114 = vmatpush1.bf16.msra.mxu0 %v2840_v28  ;;  %2146 = vmatpush1.bf16.msra.mxu1 %v2844_v31 }
 0x212   :  { %2116 = vmatprep.subr.bf16.mxu0 %v2850_v35  ;;  %2148 = vmatprep.subr.bf16.mxu1 %v2856_v40 }
 0x213   :  { %865 = vmatprep.mubr.f32.mxu0 %v2739_v0  ;;  %936 = vmatprep.mubr.f32.mxu1 %v2739_v0 }
 0x215   :  { %2118 = vmatpush1.bf16.msra.mxu0 %v2858_v41  ;;  %2150 = vmatpush1.bf16.msra.mxu1 %v2862_v44 }
 0x216   :  { %2120 = vmatprep.subr.bf16.mxu0 %v2868_v48  ;;  %2152 = vmatprep.subr.bf16.mxu1 %v2875_v53 }
 0x219   :  { %2122 = vmatpush1.bf16.msra.mxu0 %v2877_v54  ;;  %2154 = vmatpush1.bf16.msra.mxu1 %v2881_v57 }
 0x21a   :  { %2124 = vmatprep.subr.bf16.mxu0 %v2887_v61  ;;  %2156 = vmatprep.subr.bf16.mxu1 %v2894_v3 }
 0x21d   :  { %2126 = vmatpush1.bf16.msra.mxu0 %v2896_v4  ;;  %2158 = vmatpush1.bf16.msra.mxu1 %v2900_v7 }
 0x21e   :  { %2128 = vmatprep.subr.bf16.mxu0 %v2906_v11  ;;  %2160 = vmatprep.subr.bf16.mxu1 %v2913_v17 }
 0x221   :  { %2130 = vmatpush1.bf16.msra.mxu0 %v2915_v18  ;;  %2162 = vmatpush1.bf16.msra.mxu1 %v2919_v21 }
 0x222   :  { %2132 = vmatprep.subr.bf16.mxu0 %v2925_v26  ;;  %2164 = vmatprep.subr.bf16.mxu1 %v2932_v34 }
 0x225   :  { %2134 = vmatpush1.bf16.msra.mxu0 %v2934_v36  ;;  %2166 = vmatpush1.bf16.msra.mxu1 %v2938_v39 }
 0x226   :  { %2136 = vmatprep.subr.bf16.mxu0 %v2945_v46  ;;  %2168 = vmatprep.subr.bf16.mxu1 %v2949_v51 }
 0x229   :  { %2138 = vmatpush1.bf16.msra.mxu0 %v2953_v58  ;;  %2170 = vmatpush1.bf16.msra.mxu1 %v2955_v59 }
 0x22a   :  { %2140 = vmatprep.subr.bf16.mxu0 %v2959_v1  ;;  %2172 = vmatprep.subr.bf16.mxu1 %v2963_v8 }
 0x22d   :  { %2142 = vmatpush1.bf16.msra.mxu0 %v2965_v9  ;;  %2174 = vmatpush1.bf16.msra.mxu1 %v2969_v13 }
 0x22e   :  { %2176 = vmatprep.subr.bf16.mxu0 %v2833_v22  ;;  %2208 = vmatprep.subr.bf16.mxu1 %v2838_v27 }
 0x2e3   :  { %v703_v25 = vpop.f32.mrb[4].mxu0  ;;  %v774_v45 = vpop.f32.mrb[6].mxu1 }
 0x2e4   :  { %v2525_v50 = vadd.f32 %v703_v25, %v2986_v23  ;;  %v705_v52 = vpop.f32.mrb[5].mxu0  ;;  %v776_v55 = vpop.f32.mrb[7].mxu1  ;;  %v2543_v2 = vadd.f32 %v774_v45, %v2998_v49 }
 0x2e5   :  { %v2526_v56 = vadd.f32 %v705_v52, %v2988_v24  ;;  %v2544_v63 = vadd.f32 %v776_v55, %v2996_v47 }
 0x2e6   :  { %v779_v60 = vmul.f32 0.5, %v2525_v50  ;;  %v781_v5 = vmul.f32 0.5, %v2543_v2 }
 0x2e7   :  { %v780_v62 = vmul.f32 0.5, %v2526_v56 }
 0x2e8   :  { %2614 = vtanh.f32 %v779_v60 }
 0x2e9   :  { %2616 = vtanh.f32 %v780_v62 }
 0x2ea   :  { %2618 = vtanh.f32 %v2544_v63 }
 0x2eb   :  { %2620 = vtanh.f32 %v781_v5 }
 0x2f2   :  { %v2615_v6 = vpop.eup %2614 }
 0x2f3   :  { %v785_v10 = vmul.f32 0.5, %v2615_v6  ;;  %v2617_v12 = vpop.eup %2616 }
 0x2f4   :  { %v786_v19 = vmul.f32 0.5, %v2617_v12  ;;  %v2619_v14 = vpop.eup %2618 }
 0x2f5   :  { %v788_v16 = vadd.f32 0.5, %v785_v10  ;;  %v2621_v42 = vpop.eup %2620 }
 0x2f6   :  { %v789_v20 = vadd.f32 0.5, %v786_v19  ;;  %v787_v15 = vmul.f32 0.5, %v2621_v42 }
 0x2f7   :  { %v793_v30 = vmul.f32 %v2619_v14, %v788_v16 }
 0x2f8   :  { %v792_v37 = vmul.f32 %v789_v20, %v3043_v32  ;;  %v790_v43 = vadd.f32 0.5, %v787_v15 }
 0x2fa   :  { %v3085_v38 = vadd.f32 %v793_v30, %v792_v37 }
 0x2fc   :  { %2622 = vtanh.f32 %v3085_v38 }
 0x306   :  { %v2623_v25 = vpop.eup %2622 }
 0x307   :  { %v796_v45 = vmul.f32 %v2623_v25, %v790_v43 }
 0x309   :  { %866 = vmatmul.mubr.f32.vlgmr.msra.gmra.mrb[6].mxu0 %v796_v45  ;;  %937 = vmatmul.mubr.f32.vlgmr.msra.gmra.mrb[8].mxu1 %v796_v45 }
 0x30a   :  { %2178 = vmatpush1.bf16.msra.mxu0 %v2840_v28  ;;  %2210 = vmatpush1.bf16.msra.mxu1 %v2844_v31 }
 0x30b   :  { %2180 = vmatprep.subr.bf16.mxu0 %v2850_v35  ;;  %2212 = vmatprep.subr.bf16.mxu1 %v2856_v40 }
 0x30c   :  { %1029 = vmatprep.mubr.f32.mxu0 %v2739_v0  ;;  %1100 = vmatprep.mubr.f32.mxu1 %v2739_v0 }
 0x30e   :  { %2182 = vmatpush1.bf16.msra.mxu0 %v2858_v41  ;;  %2214 = vmatpush1.bf16.msra.mxu1 %v2862_v44 }
 0x30f   :  { %2184 = vmatprep.subr.bf16.mxu0 %v2868_v48  ;;  %2216 = vmatprep.subr.bf16.mxu1 %v2875_v53 }
 0x312   :  { %2186 = vmatpush1.bf16.msra.mxu0 %v2877_v54  ;;  %2218 = vmatpush1.bf16.msra.mxu1 %v2881_v57 }
 0x313   :  { %2188 = vmatprep.subr.bf16.mxu0 %v2887_v61  ;;  %2220 = vmatprep.subr.bf16.mxu1 %v2894_v3 }
 0x316   :  { %2190 = vmatpush1.bf16.msra.mxu0 %v2896_v4  ;;  %2222 = vmatpush1.bf16.msra.mxu1 %v2900_v7 }
 0x317   :  { %2192 = vmatprep.subr.bf16.mxu0 %v2906_v11  ;;  %2224 = vmatprep.subr.bf16.mxu1 %v2913_v17 }
 0x31a   :  { %2194 = vmatpush1.bf16.msra.mxu0 %v2915_v18  ;;  %2226 = vmatpush1.bf16.msra.mxu1 %v2919_v21 }
 0x31b   :  { %2196 = vmatprep.subr.bf16.mxu0 %v2925_v26  ;;  %2228 = vmatprep.subr.bf16.mxu1 %v2932_v34 }
 0x31e   :  { %2198 = vmatpush1.bf16.msra.mxu0 %v2934_v36  ;;  %2230 = vmatpush1.bf16.msra.mxu1 %v2938_v39 }
 0x31f   :  { %2200 = vmatprep.subr.bf16.mxu0 %v2945_v46  ;;  %2232 = vmatprep.subr.bf16.mxu1 %v2949_v51 }
 0x322   :  { %2202 = vmatpush1.bf16.msra.mxu0 %v2953_v58  ;;  %2234 = vmatpush1.bf16.msra.mxu1 %v2955_v59 }
 0x323   :  { %2204 = vmatprep.subr.bf16.mxu0 %v2959_v1  ;;  %2236 = vmatprep.subr.bf16.mxu1 %v2963_v8 }
 0x326   :  { %2206 = vmatpush1.bf16.msra.mxu0 %v2965_v9  ;;  %2238 = vmatpush1.bf16.msra.mxu1 %v2969_v13 }
 0x327   :  { %2240 = vmatprep.subr.bf16.mxu0 %v2833_v22  ;;  %2272 = vmatprep.subr.bf16.mxu1 %v2838_v27 }
 0x3dc   :  { %v867_v32 = vpop.f32.mrb[6].mxu0  ;;  %v938_v50 = vpop.f32.mrb[8].mxu1 }
 0x3dd   :  { %v2527_v52 = vadd.f32 %v867_v32, %v2986_v23  ;;  %v869_v55 = vpop.f32.mrb[7].mxu0  ;;  %v940_v56 = vpop.f32.mrb[9].mxu1  ;;  %v2545_v5 = vadd.f32 %v938_v50, %v2998_v49 }
 0x3de   :  { %v2528_v60 = vadd.f32 %v869_v55, %v2988_v24  ;;  %v2546_v2 = vadd.f32 %v940_v56, %v2996_v47 }
 0x3df   :  { %v943_v62 = vmul.f32 0.5, %v2527_v52  ;;  %v945_v6 = vmul.f32 0.5, %v2545_v5 }
 0x3e0   :  { %v944_v63 = vmul.f32 0.5, %v2528_v60 }
 0x3e1   :  { %2624 = vtanh.f32 %v943_v62 }
 0x3e2   :  { %2626 = vtanh.f32 %v944_v63 }
 0x3e3   :  { %2628 = vtanh.f32 %v2546_v2 }
 0x3e4   :  { %2630 = vtanh.f32 %v945_v6 }
 0x3eb   :  { %v2625_v10 = vpop.eup %2624 }
 0x3ec   :  { %v949_v12 = vmul.f32 0.5, %v2625_v10  ;;  %v2627_v16 = vpop.eup %2626 }
 0x3ed   :  { %v950_v14 = vmul.f32 0.5, %v2627_v16  ;;  %v2629_v20 = vpop.eup %2628 }
 0x3ee   :  { %v952_v19 = vadd.f32 0.5, %v949_v12  ;;  %v2631_v43 = vpop.eup %2630 }
 0x3ef   :  { %v953_v30 = vadd.f32 0.5, %v950_v14  ;;  %v951_v25 = vmul.f32 0.5, %v2631_v43 }
 0x3f0   :  { %v957_v37 = vmul.f32 %v2629_v20, %v952_v19 }
 0x3f1   :  { %v956_v42 = vmul.f32 %v953_v30, %v3085_v38  ;;  %v954_v45 = vadd.f32 0.5, %v951_v25 }
 0x3f3   :  { %v3127_v15 = vadd.f32 %v957_v37, %v956_v42 }
 0x3f5   :  { %2632 = vtanh.f32 %v3127_v15 }
 0x3ff   :  { %v2633_v32 = vpop.eup %2632 }
 0x400   :  { %v960_v50 = vmul.f32 %v2633_v32, %v954_v45 }
 0x402   :  { %1030 = vmatmul.mubr.f32.vlgmr.msra.gmra.mrb[8].mxu0 %v960_v50  ;;  %1101 = vmatmul.mubr.f32.vlgmr.msra.gmra.mrb[10].mxu1 %v960_v50 }
 0x403   :  { %2242 = vmatpush1.bf16.msra.mxu0 %v2840_v28  ;;  %2274 = vmatpush1.bf16.msra.mxu1 %v2844_v31 }
 0x404   :  { %2244 = vmatprep.subr.bf16.mxu0 %v2850_v35  ;;  %2276 = vmatprep.subr.bf16.mxu1 %v2856_v40 }
 0x405   :  { %1193 = vmatprep.mubr.f32.mxu0 %v2739_v0  ;;  %1264 = vmatprep.mubr.f32.mxu1 %v2739_v0 }
 0x407   :  { %2246 = vmatpush1.bf16.msra.mxu0 %v2858_v41  ;;  %2278 = vmatpush1.bf16.msra.mxu1 %v2862_v44 }
 0x408   :  { %2248 = vmatprep.subr.bf16.mxu0 %v2868_v48  ;;  %2280 = vmatprep.subr.bf16.mxu1 %v2875_v53 }
 0x40b   :  { %2250 = vmatpush1.bf16.msra.mxu0 %v2877_v54  ;;  %2282 = vmatpush1.bf16.msra.mxu1 %v2881_v57 }
 0x40c   :  { %2252 = vmatprep.subr.bf16.mxu0 %v2887_v61  ;;  %2284 = vmatprep.subr.bf16.mxu1 %v2894_v3 }
 0x40f   :  { %2254 = vmatpush1.bf16.msra.mxu0 %v2896_v4  ;;  %2286 = vmatpush1.bf16.msra.mxu1 %v2900_v7 }
 0x410   :  { %2256 = vmatprep.subr.bf16.mxu0 %v2906_v11  ;;  %2288 = vmatprep.subr.bf16.mxu1 %v2913_v17 }
 0x413   :  { %2258 = vmatpush1.bf16.msra.mxu0 %v2915_v18  ;;  %2290 = vmatpush1.bf16.msra.mxu1 %v2919_v21 }
 0x414   :  { %2260 = vmatprep.subr.bf16.mxu0 %v2925_v26  ;;  %2292 = vmatprep.subr.bf16.mxu1 %v2932_v34 }
 0x417   :  { %2262 = vmatpush1.bf16.msra.mxu0 %v2934_v36  ;;  %2294 = vmatpush1.bf16.msra.mxu1 %v2938_v39 }
 0x418   :  { %2264 = vmatprep.subr.bf16.mxu0 %v2945_v46  ;;  %2296 = vmatprep.subr.bf16.mxu1 %v2949_v51 }
 0x41b   :  { %2266 = vmatpush1.bf16.msra.mxu0 %v2953_v58  ;;  %2298 = vmatpush1.bf16.msra.mxu1 %v2955_v59 }
 0x41c   :  { %2268 = vmatprep.subr.bf16.mxu0 %v2959_v1  ;;  %2300 = vmatprep.subr.bf16.mxu1 %v2963_v8 }
 0x41f   :  { %2270 = vmatpush1.bf16.msra.mxu0 %v2965_v9  ;;  %2302 = vmatpush1.bf16.msra.mxu1 %v2969_v13 }
 0x420   :  { %2304 = vmatprep.subr.bf16.mxu0 %v2833_v22  ;;  %2336 = vmatprep.subr.bf16.mxu1 %v2838_v27 }
 0x4d5   :  { %v1031_v38 = vpop.f32.mrb[8].mxu0  ;;  %v1102_v52 = vpop.f32.mrb[10].mxu1 }
 0x4d6   :  { %v2529_v55 = vadd.f32 %v1031_v38, %v2986_v23  ;;  %v1033_v56 = vpop.f32.mrb[9].mxu0  ;;  %v1104_v60 = vpop.f32.mrb[11].mxu1  ;;  %v2547_v6 = vadd.f32 %v1102_v52, %v2998_v49 }
 0x4d7   :  { %v2530_v62 = vadd.f32 %v1033_v56, %v2988_v24  ;;  %v2548_v5 = vadd.f32 %v1104_v60, %v2996_v47 }
 0x4d8   :  { %v1107_v63 = vmul.f32 0.5, %v2529_v55  ;;  %v1109_v10 = vmul.f32 0.5, %v2547_v6 }
 0x4d9   :  { %v1108_v2 = vmul.f32 0.5, %v2530_v62 }
 0x4da   :  { %2634 = vtanh.f32 %v1107_v63 }
 0x4db   :  { %2636 = vtanh.f32 %v1108_v2 }
 0x4dc   :  { %2638 = vtanh.f32 %v2548_v5 }
 0x4dd   :  { %2640 = vtanh.f32 %v1109_v10 }
 0x4e4   :  { %v2635_v12 = vpop.eup %2634 }
 0x4e5   :  { %v1113_v16 = vmul.f32 0.5, %v2635_v12  ;;  %v2637_v19 = vpop.eup %2636 }
 0x4e6   :  { %v1114_v20 = vmul.f32 0.5, %v2637_v19  ;;  %v2639_v30 = vpop.eup %2638 }
 0x4e7   :  { %v1116_v14 = vadd.f32 0.5, %v1113_v16  ;;  %v2641_v45 = vpop.eup %2640 }
 0x4e8   :  { %v1117_v37 = vadd.f32 0.5, %v1114_v20  ;;  %v1115_v32 = vmul.f32 0.5, %v2641_v45 }
 0x4e9   :  { %v1121_v42 = vmul.f32 %v2639_v30, %v1116_v14 }
 0x4ea   :  { %v1120_v43 = vmul.f32 %v1117_v37, %v3127_v15  ;;  %v1118_v50 = vadd.f32 0.5, %v1115_v32 }
 0x4ec   :  { %v3169_v25 = vadd.f32 %v1121_v42, %v1120_v43 }
 0x4ee   :  { %2642 = vtanh.f32 %v3169_v25 }
 0x4f8   :  { %v2643_v38 = vpop.eup %2642 }
 0x4f9   :  { %v1124_v52 = vmul.f32 %v2643_v38, %v1118_v50 }
 0x4fb   :  { %1194 = vmatmul.mubr.f32.vlgmr.msra.gmra.mrb[10].mxu0 %v1124_v52  ;;  %1265 = vmatmul.mubr.f32.vlgmr.msra.gmra.mrb[12].mxu1 %v1124_v52 }
 0x4fc   :  { %2306 = vmatpush1.bf16.msra.mxu0 %v2840_v28  ;;  %2338 = vmatpush1.bf16.msra.mxu1 %v2844_v31 }
 0x4fd   :  { %2308 = vmatprep.subr.bf16.mxu0 %v2850_v35  ;;  %2340 = vmatprep.subr.bf16.mxu1 %v2856_v40 }
 0x4fe   :  { %1357 = vmatprep.mubr.f32.mxu0 %v2739_v0  ;;  %1428 = vmatprep.mubr.f32.mxu1 %v2739_v0 }
 0x500   :  { %2310 = vmatpush1.bf16.msra.mxu0 %v2858_v41  ;;  %2342 = vmatpush1.bf16.msra.mxu1 %v2862_v44 }
 0x501   :  { %2312 = vmatprep.subr.bf16.mxu0 %v2868_v48  ;;  %2344 = vmatprep.subr.bf16.mxu1 %v2875_v53 }
 0x504   :  { %2314 = vmatpush1.bf16.msra.mxu0 %v2877_v54  ;;  %2346 = vmatpush1.bf16.msra.mxu1 %v2881_v57 }
 0x505   :  { %2316 = vmatprep.subr.bf16.mxu0 %v2887_v61  ;;  %2348 = vmatprep.subr.bf16.mxu1 %v2894_v3 }
 0x508   :  { %2318 = vmatpush1.bf16.msra.mxu0 %v2896_v4  ;;  %2350 = vmatpush1.bf16.msra.mxu1 %v2900_v7 }
 0x509   :  { %2320 = vmatprep.subr.bf16.mxu0 %v2906_v11  ;;  %2352 = vmatprep.subr.bf16.mxu1 %v2913_v17 }
 0x50c   :  { %2322 = vmatpush1.bf16.msra.mxu0 %v2915_v18  ;;  %2354 = vmatpush1.bf16.msra.mxu1 %v2919_v21 }
 0x50d   :  { %2324 = vmatprep.subr.bf16.mxu0 %v2925_v26  ;;  %2356 = vmatprep.subr.bf16.mxu1 %v2932_v34 }
 0x510   :  { %2326 = vmatpush1.bf16.msra.mxu0 %v2934_v36  ;;  %2358 = vmatpush1.bf16.msra.mxu1 %v2938_v39 }
 0x511   :  { %2328 = vmatprep.subr.bf16.mxu0 %v2945_v46  ;;  %2360 = vmatprep.subr.bf16.mxu1 %v2949_v51 }
 0x514   :  { %2330 = vmatpush1.bf16.msra.mxu0 %v2953_v58  ;;  %2362 = vmatpush1.bf16.msra.mxu1 %v2955_v59 }
 0x515   :  { %2332 = vmatprep.subr.bf16.mxu0 %v2959_v1  ;;  %2364 = vmatprep.subr.bf16.mxu1 %v2963_v8 }
 0x518   :  { %2334 = vmatpush1.bf16.msra.mxu0 %v2965_v9  ;;  %2366 = vmatpush1.bf16.msra.mxu1 %v2969_v13 }
 0x519   :  { %2368 = vmatprep.subr.bf16.mxu0 %v2833_v22  ;;  %2400 = vmatprep.subr.bf16.mxu1 %v2838_v27 }
 0x5ce   :  { %v1195_v15 = vpop.f32.mrb[10].mxu0  ;;  %v1266_v55 = vpop.f32.mrb[12].mxu1 }
 0x5cf   :  { %v2531_v56 = vadd.f32 %v1195_v15, %v2986_v23  ;;  %v1197_v60 = vpop.f32.mrb[11].mxu0  ;;  %v1268_v62 = vpop.f32.mrb[13].mxu1  ;;  %v2549_v10 = vadd.f32 %v1266_v55, %v2998_v49 }
 0x5d0   :  { %v2532_v63 = vadd.f32 %v1197_v60, %v2988_v24  ;;  %v2550_v6 = vadd.f32 %v1268_v62, %v2996_v47 }
 0x5d1   :  { %v1271_v2 = vmul.f32 0.5, %v2531_v56  ;;  %v1273_v12 = vmul.f32 0.5, %v2549_v10 }
 0x5d2   :  { %v1272_v5 = vmul.f32 0.5, %v2532_v63 }
 0x5d3   :  { %2644 = vtanh.f32 %v1271_v2 }
 0x5d4   :  { %2646 = vtanh.f32 %v1272_v5 }
 0x5d5   :  { %2648 = vtanh.f32 %v2550_v6 }
 0x5d6   :  { %2650 = vtanh.f32 %v1273_v12 }
 0x5dd   :  { %v2645_v16 = vpop.eup %2644 }
 0x5de   :  { %v1277_v19 = vmul.f32 0.5, %v2645_v16  ;;  %v2647_v14 = vpop.eup %2646 }
 0x5df   :  { %v1278_v30 = vmul.f32 0.5, %v2647_v14  ;;  %v2649_v37 = vpop.eup %2648 }
 0x5e0   :  { %v1280_v20 = vadd.f32 0.5, %v1277_v19  ;;  %v2651_v50 = vpop.eup %2650 }
 0x5e1   :  { %v1281_v42 = vadd.f32 0.5, %v1278_v30  ;;  %v1279_v38 = vmul.f32 0.5, %v2651_v50 }
 0x5e2   :  { %v1285_v43 = vmul.f32 %v2649_v37, %v1280_v20 }
 0x5e3   :  { %v1284_v45 = vmul.f32 %v1281_v42, %v3169_v25  ;;  %v1282_v52 = vadd.f32 0.5, %v1279_v38 }
 0x5e5   :  { %v3211_v32 = vadd.f32 %v1285_v43, %v1284_v45 }
 0x5e7   :  { %2652 = vtanh.f32 %v3211_v32 }
 0x5f1   :  { %v2653_v15 = vpop.eup %2652 }
 0x5f2   :  { %v1288_v55 = vmul.f32 %v2653_v15, %v1282_v52 }
 0x5f4   :  { %1358 = vmatmul.mubr.f32.vlgmr.msra.gmra.mrb[12].mxu0 %v1288_v55  ;;  %1429 = vmatmul.mubr.f32.vlgmr.msra.gmra.mrb[14].mxu1 %v1288_v55 }
 0x5f5   :  { %2370 = vmatpush1.bf16.msra.mxu0 %v2840_v28  ;;  %2402 = vmatpush1.bf16.msra.mxu1 %v2844_v31 }
 0x5f6   :  { %2372 = vmatprep.subr.bf16.mxu0 %v2850_v35  ;;  %2404 = vmatprep.subr.bf16.mxu1 %v2856_v40 }
 0x5f7   :  { %1521 = vmatprep.mubr.f32.mxu0 %v2739_v0  ;;  %1592 = vmatprep.mubr.f32.mxu1 %v2739_v0 }
 0x5f9   :  { %2374 = vmatpush1.bf16.msra.mxu0 %v2858_v41  ;;  %2406 = vmatpush1.bf16.msra.mxu1 %v2862_v44 }
 0x5fa   :  { %2376 = vmatprep.subr.bf16.mxu0 %v2868_v48  ;;  %2408 = vmatprep.subr.bf16.mxu1 %v2875_v53 }
 0x5fd   :  { %2378 = vmatpush1.bf16.msra.mxu0 %v2877_v54  ;;  %2410 = vmatpush1.bf16.msra.mxu1 %v2881_v57 }
 0x5fe   :  { %2380 = vmatprep.subr.bf16.mxu0 %v2887_v61  ;;  %2412 = vmatprep.subr.bf16.mxu1 %v2894_v3 }
 0x601   :  { %2382 = vmatpush1.bf16.msra.mxu0 %v2896_v4  ;;  %2414 = vmatpush1.bf16.msra.mxu1 %v2900_v7 }
 0x602   :  { %2384 = vmatprep.subr.bf16.mxu0 %v2906_v11  ;;  %2416 = vmatprep.subr.bf16.mxu1 %v2913_v17 }
 0x605   :  { %2386 = vmatpush1.bf16.msra.mxu0 %v2915_v18  ;;  %2418 = vmatpush1.bf16.msra.mxu1 %v2919_v21 }
 0x606   :  { %2388 = vmatprep.subr.bf16.mxu0 %v2925_v26  ;;  %2420 = vmatprep.subr.bf16.mxu1 %v2932_v34 }
 0x609   :  { %2390 = vmatpush1.bf16.msra.mxu0 %v2934_v36  ;;  %2422 = vmatpush1.bf16.msra.mxu1 %v2938_v39 }
 0x60a   :  { %2392 = vmatprep.subr.bf16.mxu0 %v2945_v46  ;;  %2424 = vmatprep.subr.bf16.mxu1 %v2949_v51 }
 0x60d   :  { %2394 = vmatpush1.bf16.msra.mxu0 %v2953_v58  ;;  %2426 = vmatpush1.bf16.msra.mxu1 %v2955_v59 }
 0x60e   :  { %2396 = vmatprep.subr.bf16.mxu0 %v2959_v1  ;;  %2428 = vmatprep.subr.bf16.mxu1 %v2963_v8 }
 0x611   :  { %2398 = vmatpush1.bf16.msra.mxu0 %v2965_v9  ;;  %2430 = vmatpush1.bf16.msra.mxu1 %v2969_v13 }
 0x612   :  { %2432 = vmatprep.subr.bf16.mxu0 %v2833_v22  ;;  %2464 = vmatprep.subr.bf16.mxu1 %v2838_v27 }
 0x6c7   :  { %v1359_v25 = vpop.f32.mrb[12].mxu0  ;;  %v1430_v56 = vpop.f32.mrb[14].mxu1 }
 0x6c8   :  { %v2533_v60 = vadd.f32 %v1359_v25, %v2986_v23  ;;  %v1361_v62 = vpop.f32.mrb[13].mxu0  ;;  %v1432_v63 = vpop.f32.mrb[15].mxu1  ;;  %v2551_v12 = vadd.f32 %v1430_v56, %v2998_v49  ;;  %v1784_v25 = vld [vmem:[%s3372_s3 + $0x18] sm:$0xff] }
 0x6c9   :  { %v2534_v2 = vadd.f32 %v1361_v62, %v2988_v24  ;;  %v2552_v10 = vadd.f32 %v1432_v63, %v2996_v47  ;;  %v1786_v62 = vld [vmem:[%s3372_s3 + $0x28] sm:$0xff] }
 0x6ca   :  { %v1435_v5 = vmul.f32 0.5, %v2533_v60  ;;  %v1437_v22 = vmul.f32 0.5, %v2551_v12  ;;  %v1785_v60 = vld [vmem:[%s3372_s3 + $0x20] sm:$0xff]  ;;  %v1790_v12 = vld [vmem:[%s3372_s3 + $0x48] sm:$0xff] }
 0x6cb   :  { %v1436_v6 = vmul.f32 0.5, %v2534_v2  ;;  %v2502_v63 = vpack.c.bf16 %v1786_v62, %v1785_v60  ;;  %v1787_v2 = vld [vmem:[%s3372_s3 + $0x30] sm:$0xff] }
 0x6cc   :  { %2654 = vtanh.f32 %v1435_v5  ;;  %v1788_v5 = vld [vmem:[%s3372_s3 + $0x38] sm:$0xff] }
 0x6cd   :  { %2656 = vtanh.f32 %v1436_v6  ;;  %v2505_v6 = vpack.c.bf16 %v1788_v5, %v1787_v2 }
 0x6ce   :  { %2658 = vtanh.f32 %v2552_v10  ;;  %v1789_v10 = vld [vmem:[%s3372_s3 + $0x40] sm:$0xff] }
 0x6cf   :  { %2660 = vtanh.f32 %v1437_v22  ;;  %v2508_v22 = vpack.c.bf16 %v1790_v12, %v1789_v10 }
 0x6d6   :  { %v2655_v16 = vpop.eup %2654 }
 0x6d7   :  { %v1441_v27 = vmul.f32 0.5, %v2655_v16  ;;  %v2657_v19 = vpop.eup %2656  ;;  %v1791_v16 = vld [vmem:[%s3372_s3 + $0x50] sm:$0xff] }
 0x6d8   :  { %v1442_v20 = vmul.f32 0.5, %v2657_v19  ;;  %v2659_v30 = vpop.eup %2658 }
 0x6d9   :  { %v1444_v14 = vadd.f32 0.5, %v1441_v27  ;;  %v2661_v50 = vpop.eup %2660  ;;  %v1792_v27 = vld [vmem:[%s3372_s3 + $0x58] sm:$0xff] }
 0x6da   :  { %v1445_v37 = vadd.f32 0.5, %v1442_v20  ;;  %v1443_v38 = vmul.f32 0.5, %v2661_v50  ;;  %v2511_v19 = vpack.c.bf16 %v1792_v27, %v1791_v16  ;;  %v1794_v20 = vld [vmem:[%s3372_s3 + $0x68] sm:$0xff] }
 0x6db   :  { %v1449_v42 = vmul.f32 %v2659_v30, %v1444_v14  ;;  %v1793_v14 = vld [vmem:[%s3372_s3 + $0x60] sm:$0xff] }
 0x6dc   :  { %v1448_v43 = vmul.f32 %v1445_v37, %v3211_v32  ;;  %v1446_v52 = vadd.f32 0.5, %v1443_v38  ;;  %v1783_v32 = vld [vmem:[%s3372_s3 + $0x10] sm:$0xff]  ;;  %v2514_v30 = vpack.c.bf16 %v1794_v20, %v1793_v14 }
 0x6dd   :  { %v2499_v56 = vpack.c.bf16 %v1784_v25, %v1783_v32  ;;  %v1795_v37 = vld [vmem:[%s3372_s3 + $0x70] sm:$0xff] }
 0x6de   :  { %v3253_v45 = vadd.f32 %v1449_v42, %v1448_v43  ;;  %v1796_v42 = vld [vmem:[%s3372_s3 + $0x78] sm:$0xff] }
 0x6df   :  { %v2517_v43 = vpack.c.bf16 %v1796_v42, %v1795_v37 }
 0x6e0   :  { %2662 = vtanh.f32 %v3253_v45 }
 0x6ea   :  { %v2663_v15 = vpop.eup %2662 }
 0x6eb   :  { %v1452_v55 = vmul.f32 %v2663_v15, %v1446_v52 }
 0x6ed   :  { %1522 = vmatmul.mubr.f32.vlgmr.msra.gmra.mrb[14].mxu0 %v1452_v55  ;;  %1593 = vmatmul.mubr.f32.vlgmr.msra.gmra.mrb[16].mxu1 %v1452_v55 }
 0x6ee   :  { %2434 = vmatpush1.bf16.msra.mxu0 %v2840_v28  ;;  %2466 = vmatpush1.bf16.msra.mxu1 %v2844_v31 }
 0x6ef   :  { %2436 = vmatprep.subr.bf16.mxu0 %v2850_v35  ;;  %2468 = vmatprep.subr.bf16.mxu1 %v2856_v40 }
 0x6f0   :  { %1685 = vmatprep.mubr.f32.mxu0 %v2739_v0  ;;  %1756 = vmatprep.mubr.f32.mxu1 %v2739_v0 }
 0x6f2   :  { %2438 = vmatpush1.bf16.msra.mxu0 %v2858_v41  ;;  %2470 = vmatpush1.bf16.msra.mxu1 %v2862_v44 }
 0x6f3   :  { %2440 = vmatprep.subr.bf16.mxu0 %v2868_v48  ;;  %2472 = vmatprep.subr.bf16.mxu1 %v2875_v53 }
 0x6f6   :  { %2442 = vmatpush1.bf16.msra.mxu0 %v2877_v54  ;;  %2474 = vmatpush1.bf16.msra.mxu1 %v2881_v57 }
 0x6f7   :  { %2444 = vmatprep.subr.bf16.mxu0 %v2887_v61  ;;  %2476 = vmatprep.subr.bf16.mxu1 %v2894_v3 }
 0x6fa   :  { %2446 = vmatpush1.bf16.msra.mxu0 %v2896_v4  ;;  %2478 = vmatpush1.bf16.msra.mxu1 %v2900_v7 }
 0x6fb   :  { %2448 = vmatprep.subr.bf16.mxu0 %v2906_v11  ;;  %2480 = vmatprep.subr.bf16.mxu1 %v2913_v17 }
 0x6fe   :  { %2450 = vmatpush1.bf16.msra.mxu0 %v2915_v18  ;;  %2482 = vmatpush1.bf16.msra.mxu1 %v2919_v21 }
 0x6ff   :  { %2452 = vmatprep.subr.bf16.mxu0 %v2925_v26  ;;  %2484 = vmatprep.subr.bf16.mxu1 %v2932_v34 }
 0x702   :  { %2454 = vmatpush1.bf16.msra.mxu0 %v2934_v36  ;;  %2486 = vmatpush1.bf16.msra.mxu1 %v2938_v39 }
 0x703   :  { %2456 = vmatprep.subr.bf16.mxu0 %v2945_v46  ;;  %2488 = vmatprep.subr.bf16.mxu1 %v2949_v51 }
 0x706   :  { %2458 = vmatpush1.bf16.msra.mxu0 %v2953_v58  ;;  %2490 = vmatpush1.bf16.msra.mxu1 %v2955_v59 }
 0x707   :  { %2460 = vmatprep.subr.bf16.mxu0 %v2959_v1  ;;  %2492 = vmatprep.subr.bf16.mxu1 %v2963_v8  ;;  %v1781_v1 = vld [vmem:[%s3372_s3] sm:$0xff]  ;;  %v1782_v8 = vld [vmem:[%s3372_s3 + $0x8] sm:$0xff] }
 0x70a   :  { %2462 = vmatpush1.bf16.msra.mxu0 %v2965_v9  ;;  %2494 = vmatpush1.bf16.msra.mxu1 %v2969_v13  ;;  %v2496_v9 = vpack.c.bf16 %v1782_v8, %v1781_v1  ;;  %v2740_v13 = vmov 0.0|0.0  }
 0x70b   :  { %2495 = vmatprep.subr.bf16.mxu0 %v2740_v13 }
 0x7c0   :  { %v1523_v28 = vpop.f32.mrb[14].mxu0  ;;  %v1594_v31 = vpop.f32.mrb[16].mxu1 }
 0x7c1   :  { %v2535_v35 = vadd.f32 %v1523_v28, %v2986_v23  ;;  %v1525_v40 = vpop.f32.mrb[15].mxu0  ;;  %v1596_v41 = vpop.f32.mrb[17].mxu1  ;;  %v2553_v57 = vadd.f32 %v1594_v31, %v2998_v49 }
 0x7c2   :  { %v2536_v44 = vadd.f32 %v1525_v40, %v2988_v24  ;;  %v2554_v54 = vadd.f32 %v1596_v41, %v2996_v47 }
 0x7c3   :  { %v1599_v48 = vmul.f32 0.5, %v2535_v35  ;;  %v1601_v61 = vmul.f32 0.5, %v2553_v57 }
 0x7c4   :  { %v1600_v53 = vmul.f32 0.5, %v2536_v44 }
 0x7c5   :  { %2664 = vtanh.f32 %v1599_v48 }
 0x7c6   :  { %2666 = vtanh.f32 %v1600_v53 }
 0x7c7   :  { %2668 = vtanh.f32 %v2554_v54 }
 0x7c8   :  { %2670 = vtanh.f32 %v1601_v61 }
 0x7cf   :  { %v2665_v3 = vpop.eup %2664 }
 0x7d0   :  { %v1605_v4 = vmul.f32 0.5, %v2665_v3  ;;  %v2667_v7 = vpop.eup %2666 }
 0x7d1   :  { %v1606_v17 = vmul.f32 0.5, %v2667_v7  ;;  %v2669_v18 = vpop.eup %2668 }
 0x7d2   :  { %v1608_v11 = vadd.f32 0.5, %v1605_v4  ;;  %v2671_v39 = vpop.eup %2670 }
 0x7d3   :  { %v1609_v21 = vadd.f32 0.5, %v1606_v17  ;;  %v1607_v46 = vmul.f32 0.5, %v2671_v39 }
 0x7d4   :  { %v1613_v26 = vmul.f32 %v2669_v18, %v1608_v11 }
 0x7d5   :  { %v1612_v34 = vmul.f32 %v1609_v21, %v3253_v45  ;;  %v1610_v51 = vadd.f32 0.5, %v1607_v46  ;;  %v219_v45 = vadd.f32 %v2990_v29, %v2986_v23 }
 0x7d7   :  { %v3293_v36 = vadd.f32 %v1613_v26, %v1612_v34 }
 0x7d9   :  { %2672 = vtanh.f32 %v3293_v36 }
 0x7e3   :  { %v2673_v58 = vpop.eup %2672 }
 0x7e4   :  { %v1616_v59 = vmul.f32 %v2673_v58, %v1610_v51 }
 0x7e6   :  { %1686 = vmatmul.mubr.f32.vlgmr.msra.gmra.mrb[16].mxu0 %v1616_v59  ;;  %1757 = vmatmul.mubr.f32.vlgmr.msra.gmra.mrb[18].mxu1 %v1616_v59 }
 0x7e7   :  { %2497 = vmatpush3.bf16.msra.mxu0 %v2496_v9  ;;  %1972 = vmatprep.mubr.msk.f32.mxu0 %vm2741_vm2, %v2739_v0  ;;  %v221_v0 = vadd.f32 %v2993_v33, %v2988_v24 }
 0x7e8   :  { %2498 = vmatprep.subr.bf16.mxu0 %v2740_v13 }
 0x7eb   :  { %2500 = vmatpush3.bf16.msra.mxu0 %v2499_v56 }
 0x7ec   :  { %2501 = vmatprep.subr.bf16.mxu0 %v2740_v13 }
 0x7ef   :  { %2503 = vmatpush3.bf16.msra.mxu0 %v2502_v63 }
 0x7f0   :  { %2504 = vmatprep.subr.bf16.mxu0 %v2740_v13 }
 0x7f3   :  { %2506 = vmatpush3.bf16.msra.mxu0 %v2505_v6 }
 0x7f4   :  { %2507 = vmatprep.subr.bf16.mxu0 %v2740_v13 }
 0x7f7   :  { %2509 = vmatpush3.bf16.msra.mxu0 %v2508_v22 }
 0x7f8   :  { %2510 = vmatprep.subr.bf16.mxu0 %v2740_v13 }
 0x7fb   :  { %2512 = vmatpush3.bf16.msra.mxu0 %v2511_v19 }
 0x7fc   :  { %2513 = vmatprep.subr.bf16.mxu0 %v2740_v13 }
 0x7ff   :  { %2515 = vmatpush3.bf16.msra.mxu0 %v2514_v30 }
 0x800   :  { %2516 = vmatprep.subr.bf16.mxu0 %v2740_v13 }
 0x803   :  { %2518 = vmatpush3.bf16.msra.mxu0 %v2517_v43 }
 0x8b9   :  { %v1687_v50 = vpop.f32.mrb[16].mxu0  ;;  %v1758_v38 = vpop.f32.mrb[18].mxu1 }
 0x8ba   :  { %v1688_v52 = vadd.f32 %v1687_v50, %v219_v45  ;;  %v1689_v15 = vpop.f32.mrb[17].mxu0  ;;  %v1760_v55 = vpop.f32.mrb[19].mxu1  ;;  %v2555_v41 = vadd.f32 %v1758_v38, %v2998_v49  ;;  %v1922_v49 = vld [vmem:[%s3372_s3 + $0x80] ss:$0 sm:$0xff]  ;;  %s2710_s3 = scalar_lea.vmem %s1893_s23, 32 }
 0x8bb   :  { %v1690_v28 = vadd.f32 %v1689_v15, %v221_v0  ;;  %v2556_v40 = vadd.f32 %v1760_v55, %v2996_v47  ;;  %p2711_p8 = scmp.ne.s32.totalorder %s1893_s23, %s2710_s3  ;;  %p2716_p10 = scmp.lt.s32.totalorder %s2710_s3, %s2710_s3 }
 0x8bc   :  { %v1763_v31 = vmul.f32 0.5, %v1688_v52  ;;  %v1765_v44 = vmul.f32 0.5, %v2555_v41 }
 0x8bd   :  { %v1764_v35 = vmul.f32 0.5, %v1690_v28  ;;  %p2717_p11 = por %p2716_p10, %p2715_p9 }
 0x8be   :  { %2674 = vtanh.f32 %v1763_v31 }
 0x8bf   :  { %2676 = vtanh.f32 %v1764_v35  ;;  %p2718_p12 = pnand %p2717_p11, %p2711_p8 }
 0x8c0   :  { %2678 = vtanh.f32 %v2556_v40 }
 0x8c1   :  { %2680 = vtanh.f32 %v1765_v44 }
 0x8c8   :  { %v2675_v23 = vpop.eup %2674 }
 0x8c9   :  { %v1769_v29 = vmul.f32 0.5, %v2675_v23  ;;  %v2677_v48 = vpop.eup %2676 }
 0x8ca   :  { %v1770_v33 = vmul.f32 0.5, %v2677_v48  ;;  %v2679_v53 = vpop.eup %2678 }
 0x8cb   :  { %v1772_v24 = vadd.f32 0.5, %v1769_v29  ;;  %v2681_v4 = vpop.eup %2680 }
 0x8cc   :  { %v1773_v54 = vadd.f32 0.5, %v1770_v33  ;;  %v1771_v47 = vmul.f32 0.5, %v2681_v4 }
 0x8cd   :  { %v1777_v57 = vmul.f32 %v2679_v53, %v1772_v24 }
 0x8ce   :  { %v1776_v61 = vmul.f32 %v1773_v54, %v3293_v36  ;;  %v1774_v7 = vadd.f32 0.5, %v1771_v47 }
 0x8d0   :  { %v1778_v3 = vadd.f32 %v1777_v57, %v1776_v61 }
 0x8d2   :  { %2682 = vtanh.f32 %v1778_v3 }
 0x8dc   :  { %v2683_v11 = vpop.eup %2682 }
 0x8dd   :  { %v1780_v17 = vmul.f32 %v2683_v11, %v1774_v7 }
 0x8df   :  { %1973 = vmatmul.mubr.f32.vlgmr.msra.gmra.mrb[18].mxu0 %v1780_v17 }
 0x9b2   :  { %v1868_v18 = vpop.f32.mrb[18].mxu0 }
 0x9b3   :  { %v1869_v21 = vadd.f32 %v1922_v49, %v1868_v18  ;;  %v1974_v26 = vpop.f32.mrb[19].mxu0 }
 0x9b5   :  { %v1872_v34 = vsel %vm76_vm0, %v1869_v21, -inf }
 0x9b6   :  { %1873 = vmax.xlane.f32.xlu0 %v1872_v34 }
 0xa43   :  { %v1874_v39 = vpop.xlane.xlu0 %1873 }
 0xa44   :  { %v1875_v36 = vsub.f32 %v1869_v21, %v1874_v39 }
 0xa46   :  { %v1876_v46 = vmul.f32 1.442695, %v1875_v36 }
 0xa48   :  { %2684 = vpow2.f32 %v1876_v46 }
 0xa52   :  { %v2685_v51 = vpop.eup %2684 }
 0xa53   :  { %v1878_v58 = vsel %vm76_vm0, %v2685_v51, 0.0 }
 0xa54   :  { %1879 = vadd.xlane.f32.xlu0 %v1878_v58 }
 0xae1   :  { %v1880_v59 = vpop.xlane.xlu0 %1879 }
 0xae2   :  { %2686 = vlog2.f32 %v1880_v59 }
 0xaec   :  { %v2687_v1 = vpop.eup %2686 }
 0xaed   :  { %v1882_v8 = vmul.f32 0.6931472, %v2687_v1 }
 0xaef   :  { %v1883_v9 = vsub.f32 %v1875_v36, %v1882_v8 }
 0xaf1   :  { %1885 = vst.msk [vmem:[#allocation6] sm:$0x3] %vm1884_vm3, %v1883_v9 }
 0xaf2   :  { %2721 = shalt.err (!%p2718_p12)
}
 0xaf3   :  { %s2722_s26 = scalar_lea.hbm %s3373_s4, 32 }
 0xaf4   :  { %p2723_p13 = scmp.ne.s32.totalorder %s3373_s4, %s2722_s26  ;;  %p2726_p0 = scmp.lt.u32.totalorder %s2722_s26, %s3373_s4 }
 0xaf6   :  { %p2728_p1 = pnand %p2726_p0, %p2723_p13 }
 0xaf8   :  { %2731 = shalt.err (!%p2728_p1)
}
 0xaf9   :  { %1895 = dma.vmem_to_hbm [thread:$0]  %s1893_s23, 32, %s3373_s4, [#allocation5]  }
 0xafa   :  { %2734 = dma.done.wait [#allocation5], 32  }
 0xafb   :  { %2735 = vsyncadd [#allocation5], 4294967264 }
 0xafc   :  { %1899 = vsyncpa [#allocation4], 1 }
 0xafd   :  { %1900 = vsyncpa [#allocation5], 1 }

</bundles_post_ra>
